<compile_context>
chip_gen: v5e
topology: v5e:2x2
jax: 0.10.0
libtpu: 0.0.40
codegen_flags: <defaults>
</compile_context>

<pallas_src>
import functools

import jax
import jax.numpy as jnp
import numpy as np
from jax.experimental import pallas as pl
from jax.experimental.pallas import tpu as pltpu


def _round_up(x, m):
    return ((x + m - 1) // m) * m


def _lstm_fc_softmax_kernel(
    x_ref,       # (T*Bp, E)   time-major, batch-padded, flattened input
    wih_ref,     # (E, 4*Hp)   W_ih^T, gate-wise lane-padded
    whh_ref,     # (Hp, 4*Hp)  W_hh^T, gate-wise lane-padded, row-padded
    b_ref,       # (1, 4*Hp)   b_ih + b_hh, gate-wise lane-padded (pads = 0)
    fcw_ref,     # (Hp, Cp)    fc weight^T, zero-padded
    fcb_ref,     # (1, Cp)     fc bias, padded columns = -1e9
    probs_ref,   # (Bp, Cp)    output: softmax(logits)
    logits_ref,  # (Bp, Cp)    output: logits
    xw_scratch,  # (T*Bp, 4*Hp) f32 VMEM scratch: precomputed input gate pre-activations
    *,
    seq_len: int,
    batch_pad: int,
    hidden_pad: int,
):
    Bp = batch_pad
    Hp = hidden_pad

    # --- One big input projection for all timesteps, bias folded in (done once). ---
    xw_scratch[...] = (
        jnp.dot(x_ref[...], wih_ref[...], preferred_element_type=jnp.float32)
        + b_ref[...]
    )

    # --- Serial recurrence: h, c stay in vregs; loop fully unrolled (static T). ---
    h = jnp.zeros((Bp, Hp), jnp.float32)
    c = jnp.zeros((Bp, Hp), jnp.float32)

    for t in range(seq_len):
        gates = (
            xw_scratch[t * Bp:(t + 1) * Bp, :]
            + jnp.dot(h, whh_ref[...], preferred_element_type=jnp.float32)
        )  # (Bp, 4*Hp), each gate 128-lane aligned

        i_g = jax.nn.sigmoid(gates[:, 0 * Hp:1 * Hp])
        f_g = jax.nn.sigmoid(gates[:, 1 * Hp:2 * Hp])
        g_g = jnp.tanh(gates[:, 2 * Hp:3 * Hp])
        o_g = jax.nn.sigmoid(gates[:, 3 * Hp:4 * Hp])

        c = f_g * c + i_g * g_g
        h = o_g * jnp.tanh(c)
        # Padded gate columns have zero pre-activations, so padded h/c columns stay 0.

    # --- FC on the last hidden state + numerically stable softmax (lane-dense outputs). ---
    logits = (
        jnp.dot(h, fcw_ref[...], preferred_element_type=jnp.float32) + fcb_ref[...]
    )  # (Bp, Cp); padded columns are ~-1e9 from the bias
    logits_ref[...] = logits.astype(logits_ref.dtype)

    m = jnp.max(logits, axis=-1, keepdims=True)
    e = jnp.exp(logits - m)                       # padded columns -> exp(-huge) = 0
    denom = jnp.sum(e, axis=-1, keepdims=True)
    probs_ref[...] = (e * pl.reciprocal(denom, approx=True)).astype(probs_ref.dtype)


def bilstm_ner_forward(x, params):
    """x: (B, T, E) float32 (batch_first).  Returns (probs, logits), each (B, C)."""
    B, T, E = x.shape
    w_ih, w_hh, b_ih, b_hh, fc_w, fc_b = (
        params["w_ih"], params["w_hh"], params["b_ih"],
        params["b_hh"], params["fc_w"], params["fc_b"],
    )
    H = w_hh.shape[1]
    C = fc_w.shape[0]

    Bp = _round_up(B, 8)      # sublane tile
    Hp = _round_up(H, 128)    # per-gate lane-aligned width
    Cp = _round_up(C, 128)    # lane-dense output width

    # ---- Parameter / input plumbing in plain JAX (layout, padding, transposes). ----
    # Time-major, batch-padded, flattened input: (T*Bp, E).
    x_tm = jnp.transpose(x, (1, 0, 2)).astype(jnp.float32)          # (T, B, E)
    x_tm = jnp.pad(x_tm, ((0, 0), (0, Bp - B), (0, 0)))             # (T, Bp, E)
    x_flat = x_tm.reshape(T * Bp, E)

    def pad_gate_cols(w):  # (K, 4H) -> (K, 4*Hp): each gate in its own 128-lane segment
        parts = [w[:, g * H:(g + 1) * H] for g in range(4)]
        parts = [jnp.pad(p, ((0, 0), (0, Hp - H))) for p in parts]
        return jnp.concatenate(parts, axis=1)

    wih_p = pad_gate_cols(jnp.transpose(w_ih).astype(jnp.float32))  # (E, 4*Hp)
    whh_p = pad_gate_cols(jnp.transpose(w_hh).astype(jnp.float32))  # (H, 4*Hp)
    whh_p = jnp.pad(whh_p, ((0, Hp - H), (0, 0)))                   # (Hp, 4*Hp)

    b = (b_ih + b_hh).astype(jnp.float32)                           # (4H,)
    b_parts = [jnp.pad(b[g * H:(g + 1) * H], (0, Hp - H)) for g in range(4)]
    b_p = jnp.concatenate(b_parts).reshape(1, 4 * Hp)               # (1, 4*Hp)

    fcw_p = jnp.pad(jnp.transpose(fc_w).astype(jnp.float32),
                    ((0, Hp - H), (0, Cp - C)))                     # (Hp, Cp)
    fcb_p = jnp.pad(fc_b.astype(jnp.float32), (0, Cp - C),
                    constant_values=-1e9).reshape(1, Cp)            # (1, Cp)

    kernel = functools.partial(
        _lstm_fc_softmax_kernel, seq_len=T, batch_pad=Bp, hidden_pad=Hp
    )

    full = lambda shape: pl.BlockSpec(shape, lambda: (0,) * len(shape))

    probs_p, logits_p = pl.pallas_call(
        kernel,
        out_shape=(
            jax.ShapeDtypeStruct((Bp, Cp), jnp.float32),
            jax.ShapeDtypeStruct((Bp, Cp), jnp.float32),
        ),
        in_specs=[
            full((T * Bp, E)),
            full((E, 4 * Hp)),
            full((Hp, 4 * Hp)),
            full((1, 4 * Hp)),
            full((Hp, Cp)),
            full((1, Cp)),
        ],
        out_specs=(full((Bp, Cp)), full((Bp, Cp))),
        scratch_shapes=[
            pltpu.VMEM((T * Bp, 4 * Hp), jnp.float32),
        ],
    )(x_flat, wih_p, whh_p, b_p, fcw_p, fcb_p)

    # Drop batch / class padding.
    return probs_p[:B, :C], logits_p[:B, :C]


def _reference_forward(x, params):
    """Pure-JAX reference matching PyTorch nn.LSTM semantics, for validation."""
    w_ih, w_hh, b_ih, b_hh, fc_w, fc_b = (
        params["w_ih"], params["w_hh"], params["b_ih"],
        params["b_hh"], params["fc_w"], params["fc_b"],
    )
    B, T, E = x.shape
    H = w_hh.shape[1]
    h = jnp.zeros((B, H), jnp.float32)
    c = jnp.zeros((B, H), jnp.float32)
    for t in range(T):
        gates = x[:, t, :] @ w_ih.T + h @ w_hh.T + b_ih + b_hh
        i_g = jax.nn.sigmoid(gates[:, 0 * H:1 * H])
        f_g = jax.nn.sigmoid(gates[:, 1 * H:2 * H])
        g_g = jnp.tanh(gates[:, 2 * H:3 * H])
        o_g = jax.nn.sigmoid(gates[:, 3 * H:4 * H])
        c = f_g * c + i_g * g_g
        h = o_g * jnp.tanh(c)
    logits = h @ fc_w.T + fc_b
    probs = jax.nn.softmax(logits, axis=-1)
    return probs, logits


def init_params(key, embedding_dim, hidden_dim, num_outcomes):
    """Deterministic synthetic parameters with PyTorch-shaped tensors."""
    ks = jax.random.split(key, 6)
    scale = 1.0 / np.sqrt(hidden_dim)
    u = lambda k, shape: jax.random.uniform(
        k, shape, jnp.float32, minval=-scale, maxval=scale
    )
    return {
        "w_ih": u(ks[0], (4 * hidden_dim, embedding_dim)),   # weight_ih_l0
        "w_hh": u(ks[1], (4 * hidden_dim, hidden_dim)),       # weight_hh_l0
        "b_ih": u(ks[2], (4 * hidden_dim,)),                  # bias_ih_l0
        "b_hh": u(ks[3], (4 * hidden_dim,)),                  # bias_hh_l0
        "fc_w": u(ks[4], (num_outcomes, hidden_dim)),         # fc.weight
        "fc_b": u(ks[5], (num_outcomes,)),                    # fc.bias
    }


if __name__ == "__main__":
    # Small shapes consistent with the module's forward: x is (batch, seq, embedding_dim).
    B, T, E, H, C = 2, 8, 32, 32, 8

    key = jax.random.PRNGKey(0)
    k_x, k_p = jax.random.split(key)
    x = jax.random.normal(k_x, (B, T, E), jnp.float32)
    params = init_params(k_p, E, H, C)

    probs, logits = bilstm_ner_forward(x, params)
    jax.block_until_ready((probs, logits))

    ref_probs, ref_logits = _reference_forward(x, params)
    np.testing.assert_allclose(np.asarray(logits), np.asarray(ref_logits),
                               rtol=1e-4, atol=1e-4)
    # probs use the approximate EUP reciprocal -> slightly looser tolerance.
    np.testing.assert_allclose(np.asarray(probs), np.asarray(ref_probs),
                               rtol=5e-3, atol=2e-3)

    print("KERNEL_OK")
</pallas_src>

<mosaic_0001>
module attributes {stable_mosaic.version = 11 : i64} {
  func.func @_lstm_fc_softmax_kernel(%arg0: memref<64x32xf32, #tpu.memory_space<vmem>>, %arg1: memref<32x512xf32, #tpu.memory_space<vmem>>, %arg2: memref<128x512xf32, #tpu.memory_space<vmem>>, %arg3: memref<1x512xf32, #tpu.memory_space<vmem>>, %arg4: memref<128x128xf32, #tpu.memory_space<vmem>>, %arg5: memref<1x128xf32, #tpu.memory_space<vmem>>, %arg6: memref<8x128xf32, #tpu.memory_space<vmem>>, %arg7: memref<8x128xf32, #tpu.memory_space<vmem>>, %arg8: memref<64x512xf32, #tpu.memory_space<vmem>>) attributes {dimension_semantics = [], scalar_prefetch = 0 : i64, scratch_operands = 1 : i64, tpu.core_type = #tpu.core_type<tc>} {
    %c0 = arith.constant 0 : index
    %c0_0 = arith.constant 0 : index
    %0 = vector.load %arg0[%c0, %c0_0] : memref<64x32xf32, #tpu.memory_space<vmem>>, vector<64x32xf32>
    %c0_1 = arith.constant 0 : index
    %c0_2 = arith.constant 0 : index
    %1 = vector.load %arg1[%c0_1, %c0_2] : memref<32x512xf32, #tpu.memory_space<vmem>>, vector<32x512xf32>
    %cst = arith.constant dense<0.000000e+00> : vector<64x512xf32>
    %2 = tpu.matmul %0, %1, %cst {dimension_numbers = #tpu.dot_dimension_numbers<[1], [0], [0], [1], [0, 0, 1, 1], [], []>} : vector<64x32xf32>, vector<32x512xf32>, vector<64x512xf32> -> vector<64x512xf32>
    %c0_3 = arith.constant 0 : index
    %c0_4 = arith.constant 0 : index
    %3 = vector.load %arg3[%c0_3, %c0_4] : memref<1x512xf32, #tpu.memory_space<vmem>>, vector<1x512xf32>
    %4 = vector.broadcast %3 : vector<1x512xf32> to vector<64x512xf32>
    %5 = arith.addf %2, %4 : vector<64x512xf32>
    %c0_5 = arith.constant 0 : index
    %c0_6 = arith.constant 0 : index
    %6 = vector.load %arg8[%c0_5, %c0_6] : memref<64x512xf32, #tpu.memory_space<vmem>>, vector<64x512xf32>
    tpu.vector_store %arg8[%c0_5, %c0_6], %5 {strides = array<i32>} : memref<64x512xf32, #tpu.memory_space<vmem>>, vector<64x512xf32>,
    %cst_7 = arith.constant 0.000000e+00 : f32
    %7 = vector.broadcast %cst_7 : f32 to vector<8x128xf32>
    %cst_8 = arith.constant 0.000000e+00 : f32
    %8 = vector.broadcast %cst_8 : f32 to vector<8x128xf32>
    %c0_9 = arith.constant 0 : index
    %c0_10 = arith.constant 0 : index
    %9 = vector.load %arg8[%c0_9, %c0_10] : memref<64x512xf32, #tpu.memory_space<vmem>>, vector<8x512xf32>
    %c0_11 = arith.constant 0 : index
    %c0_12 = arith.constant 0 : index
    %10 = vector.load %arg2[%c0_11, %c0_12] : memref<128x512xf32, #tpu.memory_space<vmem>>, vector<128x512xf32>
    %cst_13 = arith.constant dense<0.000000e+00> : vector<8x512xf32>
    %11 = tpu.matmul %7, %10, %cst_13 {dimension_numbers = #tpu.dot_dimension_numbers<[1], [0], [0], [1], [0, 0, 1, 1], [], []>} : vector<8x128xf32>, vector<128x512xf32>, vector<8x512xf32> -> vector<8x512xf32>
    %12 = arith.addf %9, %11 : vector<8x512xf32>
    %13 = vector.extract_strided_slice %12 {offsets = [0, 0], sizes = [8, 128], strides = [1, 1]} : vector<8x512xf32> to vector<8x128xf32>
    %14 = arith.negf %13 : vector<8x128xf32>
    %15 = math.exp %14 : vector<8x128xf32>
    %cst_14 = arith.constant 1.000000e+00 : f32
    %16 = vector.broadcast %cst_14 : f32 to vector<8x128xf32>
    %17 = arith.addf %16, %15 : vector<8x128xf32>
    %18 = arith.divf %16, %17 : vector<8x128xf32>
    %19 = vector.extract_strided_slice %12 {offsets = [0, 128], sizes = [8, 128], strides = [1, 1]} : vector<8x512xf32> to vector<8x128xf32>
    %20 = arith.negf %19 : vector<8x128xf32>
    %21 = math.exp %20 : vector<8x128xf32>
    %cst_15 = arith.constant 1.000000e+00 : f32
    %22 = vector.broadcast %cst_15 : f32 to vector<8x128xf32>
    %23 = arith.addf %22, %21 : vector<8x128xf32>
    %24 = arith.divf %22, %23 : vector<8x128xf32>
    %25 = vector.extract_strided_slice %12 {offsets = [0, 256], sizes = [8, 128], strides = [1, 1]} : vector<8x512xf32> to vector<8x128xf32>
    %26 = math.tanh %25 : vector<8x128xf32>
    %27 = vector.extract_strided_slice %12 {offsets = [0, 384], sizes = [8, 128], strides = [1, 1]} : vector<8x512xf32> to vector<8x128xf32>
    %28 = arith.negf %27 : vector<8x128xf32>
    %29 = math.exp %28 : vector<8x128xf32>
    %cst_16 = arith.constant 1.000000e+00 : f32
    %30 = vector.broadcast %cst_16 : f32 to vector<8x128xf32>
    %31 = arith.addf %30, %29 : vector<8x128xf32>
    %32 = arith.divf %30, %31 : vector<8x128xf32>
    %33 = arith.mulf %24, %8 : vector<8x128xf32>
    %34 = arith.mulf %18, %26 : vector<8x128xf32>
    %35 = arith.addf %33, %34 : vector<8x128xf32>
    %36 = math.tanh %35 : vector<8x128xf32>
    %37 = arith.mulf %32, %36 : vector<8x128xf32>
    %c8 = arith.constant 8 : index
    %c0_17 = arith.constant 0 : index
    %38 = vector.load %arg8[%c8, %c0_17] : memref<64x512xf32, #tpu.memory_space<vmem>>, vector<8x512xf32>
    %c0_18 = arith.constant 0 : index
    %c0_19 = arith.constant 0 : index
    %39 = vector.load %arg2[%c0_18, %c0_19] : memref<128x512xf32, #tpu.memory_space<vmem>>, vector<128x512xf32>
    %cst_20 = arith.constant dense<0.000000e+00> : vector<8x512xf32>
    %40 = tpu.matmul %37, %39, %cst_20 {dimension_numbers = #tpu.dot_dimension_numbers<[1], [0], [0], [1], [0, 0, 1, 1], [], []>} : vector<8x128xf32>, vector<128x512xf32>, vector<8x512xf32> -> vector<8x512xf32>
    %41 = arith.addf %38, %40 : vector<8x512xf32>
    %42 = vector.extract_strided_slice %41 {offsets = [0, 0], sizes = [8, 128], strides = [1, 1]} : vector<8x512xf32> to vector<8x128xf32>
    %43 = arith.negf %42 : vector<8x128xf32>
    %44 = math.exp %43 : vector<8x128xf32>
    %cst_21 = arith.constant 1.000000e+00 : f32
    %45 = vector.broadcast %cst_21 : f32 to vector<8x128xf32>
    %46 = arith.addf %45, %44 : vector<8x128xf32>
    %47 = arith.divf %45, %46 : vector<8x128xf32>
    %48 = vector.extract_strided_slice %41 {offsets = [0, 128], sizes = [8, 128], strides = [1, 1]} : vector<8x512xf32> to vector<8x128xf32>
    %49 = arith.negf %48 : vector<8x128xf32>
    %50 = math.exp %49 : vector<8x128xf32>
    %cst_22 = arith.constant 1.000000e+00 : f32
    %51 = vector.broadcast %cst_22 : f32 to vector<8x128xf32>
    %52 = arith.addf %51, %50 : vector<8x128xf32>
    %53 = arith.divf %51, %52 : vector<8x128xf32>
    %54 = vector.extract_strided_slice %41 {offsets = [0, 256], sizes = [8, 128], strides = [1, 1]} : vector<8x512xf32> to vector<8x128xf32>
    %55 = math.tanh %54 : vector<8x128xf32>
    %56 = vector.extract_strided_slice %41 {offsets = [0, 384], sizes = [8, 128], strides = [1, 1]} : vector<8x512xf32> to vector<8x128xf32>
    %57 = arith.negf %56 : vector<8x128xf32>
    %58 = math.exp %57 : vector<8x128xf32>
    %cst_23 = arith.constant 1.000000e+00 : f32
    %59 = vector.broadcast %cst_23 : f32 to vector<8x128xf32>
    %60 = arith.addf %59, %58 : vector<8x128xf32>
    %61 = arith.divf %59, %60 : vector<8x128xf32>
    %62 = arith.mulf %53, %35 : vector<8x128xf32>
    %63 = arith.mulf %47, %55 : vector<8x128xf32>
    %64 = arith.addf %62, %63 : vector<8x128xf32>
    %65 = math.tanh %64 : vector<8x128xf32>
    %66 = arith.mulf %61, %65 : vector<8x128xf32>
    %c16 = arith.constant 16 : index
    %c0_24 = arith.constant 0 : index
    %67 = vector.load %arg8[%c16, %c0_24] : memref<64x512xf32, #tpu.memory_space<vmem>>, vector<8x512xf32>
    %c0_25 = arith.constant 0 : index
    %c0_26 = arith.constant 0 : index
    %68 = vector.load %arg2[%c0_25, %c0_26] : memref<128x512xf32, #tpu.memory_space<vmem>>, vector<128x512xf32>
    %cst_27 = arith.constant dense<0.000000e+00> : vector<8x512xf32>
    %69 = tpu.matmul %66, %68, %cst_27 {dimension_numbers = #tpu.dot_dimension_numbers<[1], [0], [0], [1], [0, 0, 1, 1], [], []>} : vector<8x128xf32>, vector<128x512xf32>, vector<8x512xf32> -> vector<8x512xf32>
    %70 = arith.addf %67, %69 : vector<8x512xf32>
    %71 = vector.extract_strided_slice %70 {offsets = [0, 0], sizes = [8, 128], strides = [1, 1]} : vector<8x512xf32> to vector<8x128xf32>
    %72 = arith.negf %71 : vector<8x128xf32>
    %73 = math.exp %72 : vector<8x128xf32>
    %cst_28 = arith.constant 1.000000e+00 : f32
    %74 = vector.broadcast %cst_28 : f32 to vector<8x128xf32>
    %75 = arith.addf %74, %73 : vector<8x128xf32>
    %76 = arith.divf %74, %75 : vector<8x128xf32>
    %77 = vector.extract_strided_slice %70 {offsets = [0, 128], sizes = [8, 128], strides = [1, 1]} : vector<8x512xf32> to vector<8x128xf32>
    %78 = arith.negf %77 : vector<8x128xf32>
    %79 = math.exp %78 : vector<8x128xf32>
    %cst_29 = arith.constant 1.000000e+00 : f32
    %80 = vector.broadcast %cst_29 : f32 to vector<8x128xf32>
    %81 = arith.addf %80, %79 : vector<8x128xf32>
    %82 = arith.divf %80, %81 : vector<8x128xf32>
    %83 = vector.extract_strided_slice %70 {offsets = [0, 256], sizes = [8, 128], strides = [1, 1]} : vector<8x512xf32> to vector<8x128xf32>
    %84 = math.tanh %83 : vector<8x128xf32>
    %85 = vector.extract_strided_slice %70 {offsets = [0, 384], sizes = [8, 128], strides = [1, 1]} : vector<8x512xf32> to vector<8x128xf32>
    %86 = arith.negf %85 : vector<8x128xf32>
    %87 = math.exp %86 : vector<8x128xf32>
    %cst_30 = arith.constant 1.000000e+00 : f32
    %88 = vector.broadcast %cst_30 : f32 to vector<8x128xf32>
    %89 = arith.addf %88, %87 : vector<8x128xf32>
    %90 = arith.divf %88, %89 : vector<8x128xf32>
    %91 = arith.mulf %82, %64 : vector<8x128xf32>
    %92 = arith.mulf %76, %84 : vector<8x128xf32>
    %93 = arith.addf %91, %92 : vector<8x128xf32>
    %94 = math.tanh %93 : vector<8x128xf32>
    %95 = arith.mulf %90, %94 : vector<8x128xf32>
    %c24 = arith.constant 24 : index
    %c0_31 = arith.constant 0 : index
    %96 = vector.load %arg8[%c24, %c0_31] : memref<64x512xf32, #tpu.memory_space<vmem>>, vector<8x512xf32>
    %c0_32 = arith.constant 0 : index
    %c0_33 = arith.constant 0 : index
    %97 = vector.load %arg2[%c0_32, %c0_33] : memref<128x512xf32, #tpu.memory_space<vmem>>, vector<128x512xf32>
    %cst_34 = arith.constant dense<0.000000e+00> : vector<8x512xf32>
    %98 = tpu.matmul %95, %97, %cst_34 {dimension_numbers = #tpu.dot_dimension_numbers<[1], [0], [0], [1], [0, 0, 1, 1], [], []>} : vector<8x128xf32>, vector<128x512xf32>, vector<8x512xf32> -> vector<8x512xf32>
    %99 = arith.addf %96, %98 : vector<8x512xf32>
    %100 = vector.extract_strided_slice %99 {offsets = [0, 0], sizes = [8, 128], strides = [1, 1]} : vector<8x512xf32> to vector<8x128xf32>
    %101 = arith.negf %100 : vector<8x128xf32>
    %102 = math.exp %101 : vector<8x128xf32>
    %cst_35 = arith.constant 1.000000e+00 : f32
    %103 = vector.broadcast %cst_35 : f32 to vector<8x128xf32>
    %104 = arith.addf %103, %102 : vector<8x128xf32>
    %105 = arith.divf %103, %104 : vector<8x128xf32>
    %106 = vector.extract_strided_slice %99 {offsets = [0, 128], sizes = [8, 128], strides = [1, 1]} : vector<8x512xf32> to vector<8x128xf32>
    %107 = arith.negf %106 : vector<8x128xf32>
    %108 = math.exp %107 : vector<8x128xf32>
    %cst_36 = arith.constant 1.000000e+00 : f32
    %109 = vector.broadcast %cst_36 : f32 to vector<8x128xf32>
    %110 = arith.addf %109, %108 : vector<8x128xf32>
    %111 = arith.divf %109, %110 : vector<8x128xf32>
    %112 = vector.extract_strided_slice %99 {offsets = [0, 256], sizes = [8, 128], strides = [1, 1]} : vector<8x512xf32> to vector<8x128xf32>
    %113 = math.tanh %112 : vector<8x128xf32>
    %114 = vector.extract_strided_slice %99 {offsets = [0, 384], sizes = [8, 128], strides = [1, 1]} : vector<8x512xf32> to vector<8x128xf32>
    %115 = arith.negf %114 : vector<8x128xf32>
    %116 = math.exp %115 : vector<8x128xf32>
    %cst_37 = arith.constant 1.000000e+00 : f32
    %117 = vector.broadcast %cst_37 : f32 to vector<8x128xf32>
    %118 = arith.addf %117, %116 : vector<8x128xf32>
    %119 = arith.divf %117, %118 : vector<8x128xf32>
    %120 = arith.mulf %111, %93 : vector<8x128xf32>
    %121 = arith.mulf %105, %113 : vector<8x128xf32>
    %122 = arith.addf %120, %121 : vector<8x128xf32>
    %123 = math.tanh %122 : vector<8x128xf32>
    %124 = arith.mulf %119, %123 : vector<8x128xf32>
    %c32 = arith.constant 32 : index
    %c0_38 = arith.constant 0 : index
    %125 = vector.load %arg8[%c32, %c0_38] : memref<64x512xf32, #tpu.memory_space<vmem>>, vector<8x512xf32>
    %c0_39 = arith.constant 0 : index
    %c0_40 = arith.constant 0 : index
    %126 = vector.load %arg2[%c0_39, %c0_40] : memref<128x512xf32, #tpu.memory_space<vmem>>, vector<128x512xf32>
    %cst_41 = arith.constant dense<0.000000e+00> : vector<8x512xf32>
    %127 = tpu.matmul %124, %126, %cst_41 {dimension_numbers = #tpu.dot_dimension_numbers<[1], [0], [0], [1], [0, 0, 1, 1], [], []>} : vector<8x128xf32>, vector<128x512xf32>, vector<8x512xf32> -> vector<8x512xf32>
    %128 = arith.addf %125, %127 : vector<8x512xf32>
    %129 = vector.extract_strided_slice %128 {offsets = [0, 0], sizes = [8, 128], strides = [1, 1]} : vector<8x512xf32> to vector<8x128xf32>
    %130 = arith.negf %129 : vector<8x128xf32>
    %131 = math.exp %130 : vector<8x128xf32>
    %cst_42 = arith.constant 1.000000e+00 : f32
    %132 = vector.broadcast %cst_42 : f32 to vector<8x128xf32>
    %133 = arith.addf %132, %131 : vector<8x128xf32>
    %134 = arith.divf %132, %133 : vector<8x128xf32>
    %135 = vector.extract_strided_slice %128 {offsets = [0, 128], sizes = [8, 128], strides = [1, 1]} : vector<8x512xf32> to vector<8x128xf32>
    %136 = arith.negf %135 : vector<8x128xf32>
    %137 = math.exp %136 : vector<8x128xf32>
    %cst_43 = arith.constant 1.000000e+00 : f32
    %138 = vector.broadcast %cst_43 : f32 to vector<8x128xf32>
    %139 = arith.addf %138, %137 : vector<8x128xf32>
    %140 = arith.divf %138, %139 : vector<8x128xf32>
    %141 = vector.extract_strided_slice %128 {offsets = [0, 256], sizes = [8, 128], strides = [1, 1]} : vector<8x512xf32> to vector<8x128xf32>
    %142 = math.tanh %141 : vector<8x128xf32>
    %143 = vector.extract_strided_slice %128 {offsets = [0, 384], sizes = [8, 128], strides = [1, 1]} : vector<8x512xf32> to vector<8x128xf32>
    %144 = arith.negf %143 : vector<8x128xf32>
    %145 = math.exp %144 : vector<8x128xf32>
    %cst_44 = arith.constant 1.000000e+00 : f32
    %146 = vector.broadcast %cst_44 : f32 to vector<8x128xf32>
    %147 = arith.addf %146, %145 : vector<8x128xf32>
    %148 = arith.divf %146, %147 : vector<8x128xf32>
    %149 = arith.mulf %140, %122 : vector<8x128xf32>
    %150 = arith.mulf %134, %142 : vector<8x128xf32>
    %151 = arith.addf %149, %150 : vector<8x128xf32>
    %152 = math.tanh %151 : vector<8x128xf32>
    %153 = arith.mulf %148, %152 : vector<8x128xf32>
    %c40 = arith.constant 40 : index
    %c0_45 = arith.constant 0 : index
    %154 = vector.load %arg8[%c40, %c0_45] : memref<64x512xf32, #tpu.memory_space<vmem>>, vector<8x512xf32>
    %c0_46 = arith.constant 0 : index
    %c0_47 = arith.constant 0 : index
    %155 = vector.load %arg2[%c0_46, %c0_47] : memref<128x512xf32, #tpu.memory_space<vmem>>, vector<128x512xf32>
    %cst_48 = arith.constant dense<0.000000e+00> : vector<8x512xf32>
    %156 = tpu.matmul %153, %155, %cst_48 {dimension_numbers = #tpu.dot_dimension_numbers<[1], [0], [0], [1], [0, 0, 1, 1], [], []>} : vector<8x128xf32>, vector<128x512xf32>, vector<8x512xf32> -> vector<8x512xf32>
    %157 = arith.addf %154, %156 : vector<8x512xf32>
    %158 = vector.extract_strided_slice %157 {offsets = [0, 0], sizes = [8, 128], strides = [1, 1]} : vector<8x512xf32> to vector<8x128xf32>
    %159 = arith.negf %158 : vector<8x128xf32>
    %160 = math.exp %159 : vector<8x128xf32>
    %cst_49 = arith.constant 1.000000e+00 : f32
    %161 = vector.broadcast %cst_49 : f32 to vector<8x128xf32>
    %162 = arith.addf %161, %160 : vector<8x128xf32>
    %163 = arith.divf %161, %162 : vector<8x128xf32>
    %164 = vector.extract_strided_slice %157 {offsets = [0, 128], sizes = [8, 128], strides = [1, 1]} : vector<8x512xf32> to vector<8x128xf32>
    %165 = arith.negf %164 : vector<8x128xf32>
    %166 = math.exp %165 : vector<8x128xf32>
    %cst_50 = arith.constant 1.000000e+00 : f32
    %167 = vector.broadcast %cst_50 : f32 to vector<8x128xf32>
    %168 = arith.addf %167, %166 : vector<8x128xf32>
    %169 = arith.divf %167, %168 : vector<8x128xf32>
    %170 = vector.extract_strided_slice %157 {offsets = [0, 256], sizes = [8, 128], strides = [1, 1]} : vector<8x512xf32> to vector<8x128xf32>
    %171 = math.tanh %170 : vector<8x128xf32>
    %172 = vector.extract_strided_slice %157 {offsets = [0, 384], sizes = [8, 128], strides = [1, 1]} : vector<8x512xf32> to vector<8x128xf32>
    %173 = arith.negf %172 : vector<8x128xf32>
    %174 = math.exp %173 : vector<8x128xf32>
    %cst_51 = arith.constant 1.000000e+00 : f32
    %175 = vector.broadcast %cst_51 : f32 to vector<8x128xf32>
    %176 = arith.addf %175, %174 : vector<8x128xf32>
    %177 = arith.divf %175, %176 : vector<8x128xf32>
    %178 = arith.mulf %169, %151 : vector<8x128xf32>
    %179 = arith.mulf %163, %171 : vector<8x128xf32>
    %180 = arith.addf %178, %179 : vector<8x128xf32>
    %181 = math.tanh %180 : vector<8x128xf32>
    %182 = arith.mulf %177, %181 : vector<8x128xf32>
    %c48 = arith.constant 48 : index
    %c0_52 = arith.constant 0 : index
    %183 = vector.load %arg8[%c48, %c0_52] : memref<64x512xf32, #tpu.memory_space<vmem>>, vector<8x512xf32>
    %c0_53 = arith.constant 0 : index
    %c0_54 = arith.constant 0 : index
    %184 = vector.load %arg2[%c0_53, %c0_54] : memref<128x512xf32, #tpu.memory_space<vmem>>, vector<128x512xf32>
    %cst_55 = arith.constant dense<0.000000e+00> : vector<8x512xf32>
    %185 = tpu.matmul %182, %184, %cst_55 {dimension_numbers = #tpu.dot_dimension_numbers<[1], [0], [0], [1], [0, 0, 1, 1], [], []>} : vector<8x128xf32>, vector<128x512xf32>, vector<8x512xf32> -> vector<8x512xf32>
    %186 = arith.addf %183, %185 : vector<8x512xf32>
    %187 = vector.extract_strided_slice %186 {offsets = [0, 0], sizes = [8, 128], strides = [1, 1]} : vector<8x512xf32> to vector<8x128xf32>
    %188 = arith.negf %187 : vector<8x128xf32>
    %189 = math.exp %188 : vector<8x128xf32>
    %cst_56 = arith.constant 1.000000e+00 : f32
    %190 = vector.broadcast %cst_56 : f32 to vector<8x128xf32>
    %191 = arith.addf %190, %189 : vector<8x128xf32>
    %192 = arith.divf %190, %191 : vector<8x128xf32>
    %193 = vector.extract_strided_slice %186 {offsets = [0, 128], sizes = [8, 128], strides = [1, 1]} : vector<8x512xf32> to vector<8x128xf32>
    %194 = arith.negf %193 : vector<8x128xf32>
    %195 = math.exp %194 : vector<8x128xf32>
    %cst_57 = arith.constant 1.000000e+00 : f32
    %196 = vector.broadcast %cst_57 : f32 to vector<8x128xf32>
    %197 = arith.addf %196, %195 : vector<8x128xf32>
    %198 = arith.divf %196, %197 : vector<8x128xf32>
    %199 = vector.extract_strided_slice %186 {offsets = [0, 256], sizes = [8, 128], strides = [1, 1]} : vector<8x512xf32> to vector<8x128xf32>
    %200 = math.tanh %199 : vector<8x128xf32>
    %201 = vector.extract_strided_slice %186 {offsets = [0, 384], sizes = [8, 128], strides = [1, 1]} : vector<8x512xf32> to vector<8x128xf32>
    %202 = arith.negf %201 : vector<8x128xf32>
    %203 = math.exp %202 : vector<8x128xf32>
    %cst_58 = arith.constant 1.000000e+00 : f32
    %204 = vector.broadcast %cst_58 : f32 to vector<8x128xf32>
    %205 = arith.addf %204, %203 : vector<8x128xf32>
    %206 = arith.divf %204, %205 : vector<8x128xf32>
    %207 = arith.mulf %198, %180 : vector<8x128xf32>
    %208 = arith.mulf %192, %200 : vector<8x128xf32>
    %209 = arith.addf %207, %208 : vector<8x128xf32>
    %210 = math.tanh %209 : vector<8x128xf32>
    %211 = arith.mulf %206, %210 : vector<8x128xf32>
    %c56 = arith.constant 56 : index
    %c0_59 = arith.constant 0 : index
    %212 = vector.load %arg8[%c56, %c0_59] : memref<64x512xf32, #tpu.memory_space<vmem>>, vector<8x512xf32>
    %c0_60 = arith.constant 0 : index
    %c0_61 = arith.constant 0 : index
    %213 = vector.load %arg2[%c0_60, %c0_61] : memref<128x512xf32, #tpu.memory_space<vmem>>, vector<128x512xf32>
    %cst_62 = arith.constant dense<0.000000e+00> : vector<8x512xf32>
    %214 = tpu.matmul %211, %213, %cst_62 {dimension_numbers = #tpu.dot_dimension_numbers<[1], [0], [0], [1], [0, 0, 1, 1], [], []>} : vector<8x128xf32>, vector<128x512xf32>, vector<8x512xf32> -> vector<8x512xf32>
    %215 = arith.addf %212, %214 : vector<8x512xf32>
    %216 = vector.extract_strided_slice %215 {offsets = [0, 0], sizes = [8, 128], strides = [1, 1]} : vector<8x512xf32> to vector<8x128xf32>
    %217 = arith.negf %216 : vector<8x128xf32>
    %218 = math.exp %217 : vector<8x128xf32>
    %cst_63 = arith.constant 1.000000e+00 : f32
    %219 = vector.broadcast %cst_63 : f32 to vector<8x128xf32>
    %220 = arith.addf %219, %218 : vector<8x128xf32>
    %221 = arith.divf %219, %220 : vector<8x128xf32>
    %222 = vector.extract_strided_slice %215 {offsets = [0, 128], sizes = [8, 128], strides = [1, 1]} : vector<8x512xf32> to vector<8x128xf32>
    %223 = arith.negf %222 : vector<8x128xf32>
    %224 = math.exp %223 : vector<8x128xf32>
    %cst_64 = arith.constant 1.000000e+00 : f32
    %225 = vector.broadcast %cst_64 : f32 to vector<8x128xf32>
    %226 = arith.addf %225, %224 : vector<8x128xf32>
    %227 = arith.divf %225, %226 : vector<8x128xf32>
    %228 = vector.extract_strided_slice %215 {offsets = [0, 256], sizes = [8, 128], strides = [1, 1]} : vector<8x512xf32> to vector<8x128xf32>
    %229 = math.tanh %228 : vector<8x128xf32>
    %230 = vector.extract_strided_slice %215 {offsets = [0, 384], sizes = [8, 128], strides = [1, 1]} : vector<8x512xf32> to vector<8x128xf32>
    %231 = arith.negf %230 : vector<8x128xf32>
    %232 = math.exp %231 : vector<8x128xf32>
    %cst_65 = arith.constant 1.000000e+00 : f32
    %233 = vector.broadcast %cst_65 : f32 to vector<8x128xf32>
    %234 = arith.addf %233, %232 : vector<8x128xf32>
    %235 = arith.divf %233, %234 : vector<8x128xf32>
    %236 = arith.mulf %227, %209 : vector<8x128xf32>
    %237 = arith.mulf %221, %229 : vector<8x128xf32>
    %238 = arith.addf %236, %237 : vector<8x128xf32>
    %239 = math.tanh %238 : vector<8x128xf32>
    %240 = arith.mulf %235, %239 : vector<8x128xf32>
    %c0_66 = arith.constant 0 : index
    %c0_67 = arith.constant 0 : index
    %241 = vector.load %arg4[%c0_66, %c0_67] : memref<128x128xf32, #tpu.memory_space<vmem>>, vector<128x128xf32>
    %cst_68 = arith.constant dense<0.000000e+00> : vector<8x128xf32>
    %242 = tpu.matmul %240, %241, %cst_68 {dimension_numbers = #tpu.dot_dimension_numbers<[1], [0], [0], [1], [0, 0, 1, 1], [], []>} : vector<8x128xf32>, vector<128x128xf32>, vector<8x128xf32> -> vector<8x128xf32>
    %c0_69 = arith.constant 0 : index
    %c0_70 = arith.constant 0 : index
    %243 = vector.load %arg5[%c0_69, %c0_70] : memref<1x128xf32, #tpu.memory_space<vmem>>, vector<1x128xf32>
    %244 = vector.broadcast %243 : vector<1x128xf32> to vector<8x128xf32>
    %245 = arith.addf %242, %244 : vector<8x128xf32>
    %c0_71 = arith.constant 0 : index
    %c0_72 = arith.constant 0 : index
    %246 = vector.load %arg7[%c0_71, %c0_72] : memref<8x128xf32, #tpu.memory_space<vmem>>, vector<8x128xf32>
    tpu.vector_store %arg7[%c0_71, %c0_72], %245 {strides = array<i32>} : memref<8x128xf32, #tpu.memory_space<vmem>>, vector<8x128xf32>,
    %cst_73 = arith.constant dense<0xFF800000> : vector<8xf32>
    %247 = vector.multi_reduction <maximumf>, %245, %cst_73 [1] : vector<8x128xf32> to vector<8xf32>
    %248 = vector.shape_cast %247 : vector<8xf32> to vector<8x1xf32>
    %249 = vector.broadcast %248 : vector<8x1xf32> to vector<8x128xf32>
    %250 = arith.subf %245, %249 : vector<8x128xf32>
    %251 = math.exp %250 : vector<8x128xf32>
    %cst_74 = arith.constant dense<0.000000e+00> : vector<8xf32>
    %252 = vector.multi_reduction <add>, %251, %cst_74 [1] : vector<8x128xf32> to vector<8xf32>
    %253 = vector.shape_cast %252 : vector<8xf32> to vector<8x1xf32>
    %254 = tpu.reciprocal %253 {approx = true} : vector<8x1xf32> -> vector<8x1xf32>
    %255 = vector.broadcast %254 : vector<8x1xf32> to vector<8x128xf32>
    %256 = arith.mulf %251, %255 : vector<8x128xf32>
    %c0_75 = arith.constant 0 : index
    %c0_76 = arith.constant 0 : index
    %257 = vector.load %arg6[%c0_75, %c0_76] : memref<8x128xf32, #tpu.memory_space<vmem>>, vector<8x128xf32>
    tpu.vector_store %arg6[%c0_75, %c0_76], %256 {strides = array<i32>} : memref<8x128xf32, #tpu.memory_space<vmem>>, vector<8x128xf32>,
    return
  }
}

</mosaic_0001>

<bundles_post_ra>
// kernel: tpu_custom_call.1
= control target key start
LH: loop header
LB: loop body
LE: loop exit
PB: predicated region body
PF: predicated region fallthrough
CT: control target
= control target key end

     0   :  { %13 = vsyncpa [#allocation4], 0  ;;  %s3134_s0 = inlined_call_operand.vmem [shape: f32[64,32], index: 0, kind: input, shape index: {}]   ;;  %s3135_s1 = inlined_call_operand.hbm [shape: f32[32,512], index: 1, kind: input, shape index: {}]   ;;  %s3136_s2 = inlined_call_operand.hbm [shape: f32[128,512], index: 2, kind: input, shape index: {}]   ;;  %s3137_s3 = inlined_call_operand.vmem [shape: f32[1,512], index: 3, kind: input, shape index: {}]   ;;  %s3138_s4 = inlined_call_operand.hbm [shape: f32[128,128], index: 4, kind: input, shape index: {}]   ;;  %s3139_s5 = inlined_call_operand.vmem [shape: f32[1,128], index: 5, kind: input, shape index: {}]   ;;  %s3140_s6 = inlined_call_operand.hbm [shape: f32[8,128], index: 6, kind: output, shape index: {0}]   ;;  %s3141_s7 = inlined_call_operand.hbm [shape: f32[8,128], index: 7, kind: output, shape index: {1}]  }
   0x1   :  { %14 = vsyncpa [#allocation7], 0 }
   0x2   :  { %15 = vsyncpa [#allocation5], 0 }
   0x3   :  { %16 = vsyncpa [#allocation11], 0  ;;  %s36_s26 = sshll.u32 %s3136_s2, 4  ;;  %s2089_s27 = smov [#allocation6]   ;;  %s37_s26 = int_to_ptr.hbm [resolvable:$true] %s36_s26 }
   0x4   :  { %s38_s28 = sshll.u32 %s2089_s27, 4  ;;  %s23_s8 = sshll.u32 %s3135_s1, 4  ;;  %s39_s28 = int_to_ptr.vmem [resolvable:$true] %s38_s28  ;;  %s24_s8 = int_to_ptr.hbm [resolvable:$true] %s23_s8 }
   0x5   :  { %s2090_s9 = smov 512   ;;  %s2091_s10 = smov 32  }
   0x6   :  { %44 = dma.hbm_to_vmem [thread:$0]  %s37_s26, 8192, %s39_s28, [#allocation7], %s2090_s9, %s2090_s9, %s2091_s10  }
   0x7   :  { %s2092_s11 = smov [#allocation3]   ;;  %s51_s15 = sshll.u32 %s3138_s4, 4  ;;  %s52_s15 = int_to_ptr.hbm [resolvable:$true] %s51_s15 }
   0x8   :  { %s25_s12 = sshll.u32 %s2092_s11, 4  ;;  %s2093_s2 = smov [#allocation8]   ;;  %s26_s12 = int_to_ptr.vmem [resolvable:$true] %s25_s12 }
   0x9   :  { %31 = dma.hbm_to_vmem [thread:$0]  %s24_s8, 2048, %s26_s12, [#allocation4], %s2090_s9, %s2090_s9, %s2091_s10  }
   0xa   :  { %s53_s16 = sshll.u32 %s2093_s2, 4  ;;  %s2094_s17 = smov 128   ;;  %s54_s16 = int_to_ptr.vmem [resolvable:$true] %s53_s16 }
   0xb   :  { %s2095_s18 = smov 8  }
   0xc   :  { %59 = dma.hbm_to_vmem [thread:$0]  %s52_s15, 2048, %s54_s16, [#allocation7], %s2094_s17, %s2094_s17, %s2095_s18  }
   0xd   :  { %2081 = dma.done.wait [#allocation4], 2048  }
   0xe   :  { %2082 = vsyncadd [#allocation4], 4294965248 }
   0xf   :  { %2083 = dma.done.wait [#allocation7], 10240  }
  0x10   :  { %2084 = vsyncadd [#allocation7], 4294957056  ;;  %v94_v0 = vld [vmem:[#allocation3 + $0x60] sm:$0xff]  ;;  %vm108_vm0 = vcmask 261120   ;;  %v2154_v5 = vld [vmem:[%s3134_s0 + $0x28] sm:$0xff]  ;;  %s2097_s12 = smov [#allocation10]  }
  0x11   :  { %v90_v1 = vld [vmem:[#allocation3 + $0x40] sm:$0xff]  ;;  %145 = vmatpush.msra.mxu0 %v94_v0  ;;  %1742 = vmatpush.msra.mxu1 %v94_v0  ;;  %v2159_v6 = vld [vmem:[%s3134_s0 + $0x30] sm:$0xff]  ;;  %v2164_v7 = vld [vmem:[%s3134_s0 + $0x38] sm:$0xff]  ;;  %s1668_s13 = sshll.u32 %s2097_s12, 4  ;;  %s1670_s2 = sshll.u32 %s3141_s7, 4  ;;  %s1669_s13 = int_to_ptr.vmem [resolvable:$true] %s1668_s13  ;;  %s1671_s2 = int_to_ptr.hbm [resolvable:$true] %s1670_s2 }
  0x12   :  { %1743 = vmatpush.msra.mxu2 %v94_v0  ;;  %1744 = vmatpush.msra.mxu3 %v94_v0  ;;  %v86_v2 = vld [vmem:[#allocation3 + $0x20] sm:$0xff]  ;;  %v95_v8 = vld [vmem:[#allocation3 + $0x68] sm:$0xff]  ;;  %v96_v9 = vld [vmem:[#allocation3 + $0x70] sm:$0xff]  ;;  %s1659_s1 = sshll.u32 %s3140_s6, 4  ;;  %s1660_s1 = int_to_ptr.hbm [resolvable:$true] %s1659_s1 }
  0x13   :  { %146 = vmatpush.msra.mxu0 %v90_v1  ;;  %1745 = vmatpush.msra.mxu1 %v90_v1  ;;  %v82_v3 = vld [vmem:[#allocation3] sm:$0xff]  ;;  %v97_v10 = vld [vmem:[#allocation3 + $0x78] sm:$0xff]  ;;  %v91_v12 = vld [vmem:[#allocation3 + $0x48] sm:$0xff] }
  0x14   :  { %1746 = vmatpush.msra.mxu2 %v90_v1  ;;  %1747 = vmatpush.msra.mxu3 %v90_v1  ;;  %v74_v4 = vld [vmem:[%s3134_s0] sm:$0xff]  ;;  %v92_v13 = vld [vmem:[#allocation3 + $0x50] sm:$0xff]  ;;  %v93_v14 = vld [vmem:[#allocation3 + $0x58] sm:$0xff] }
  0x15   :  { %147 = vmatpush.msra.mxu0 %v86_v2  ;;  %1748 = vmatpush.msra.mxu1 %v86_v2  ;;  %v2169_v11 = vld [vmem:[#allocation6 + $0x1e0] sm:$0xff]  ;;  %v87_v16 = vld [vmem:[#allocation3 + $0x28] sm:$0xff]  ;;  %v88_v17 = vld [vmem:[#allocation3 + $0x30] sm:$0xff] }
  0x16   :  { %1749 = vmatpush.msra.mxu2 %v86_v2  ;;  %1750 = vmatpush.msra.mxu3 %v86_v2  ;;  %3242 = vst [vmem:[#allocation16_spill] sm:$0xff] %v2169_v11  ;;  %v2175_v15 = vld [vmem:[#allocation6 + $0x1c0] sm:$0xff]  ;;  %v89_v18 = vld [vmem:[#allocation3 + $0x38] sm:$0xff]  ;;  %v83_v20 = vld [vmem:[#allocation3 + $0x8] sm:$0xff] }
  0x17   :  { %148 = vmatpush.msra.mxu0 %v82_v3  ;;  %1751 = vmatpush.msra.mxu1 %v82_v3  ;;  %v2178_v19 = vld [vmem:[#allocation6 + $0x1a0] sm:$0xff]  ;;  %v84_v21 = vld [vmem:[#allocation3 + $0x10] sm:$0xff]  ;;  %v85_v22 = vld [vmem:[#allocation3 + $0x18] sm:$0xff] }
  0x18   :  { %1752 = vmatpush.msra.mxu2 %v82_v3  ;;  %1753 = vmatpush.msra.mxu3 %v82_v3  ;;  %v75_v23 = vld [vmem:[%s3134_s0 + $0x8] sm:$0xff]  ;;  %v2188_v25 = vld [vmem:[#allocation6 + $0x1f8] sm:$0xff]  ;;  %v2190_v26 = vld [vmem:[#allocation6 + $0x180] sm:$0xff] }
  0x19   :  { %1686 = vmatmul.msk.f32.vlgmr.msra.gmra.mxu0 %vm108_vm0, %v74_v4  ;;  %1691 = vmatmul.msk.f32.vlgmr.msra.gmra.mxu1 %vm108_vm0, %v2154_v5  ;;  %v2185_v24 = vld [vmem:[#allocation6 + $0x1e8] sm:$0xff]  ;;  %v2196_v28 = vld [vmem:[#allocation6 + $0x1f0] sm:$0xff]  ;;  %v2200_v29 = vld [vmem:[#allocation6 + $0x160] sm:$0xff] }
  0x1a   :  { %1692 = vmatmul.msk.f32.vlgmr.msra.gmra.mxu2 %vm108_vm0, %v2159_v6  ;;  %1693 = vmatmul.msk.f32.vlgmr.msra.gmra.mxu3 %vm108_vm0, %v2164_v7  ;;  %v2194_v27 = vld [vmem:[#allocation6 + $0x1c8] sm:$0xff]  ;;  %v2202_v30 = vld [vmem:[#allocation6 + $0x1d8] sm:$0xff]  ;;  %v2208_v32 = vld [vmem:[#allocation6 + $0x1d0] sm:$0xff] }
  0x1b   :  { %186 = vmatpush.msrb.mxu1 %v95_v8  ;;  %227 = vmatpush.msrb.mxu2 %v96_v9  ;;  %v2206_v31 = vld [vmem:[#allocation6 + $0x1a8] sm:$0xff]  ;;  %v2211_v33 = vld [vmem:[#allocation6 + $0x140] sm:$0xff]  ;;  %v2213_v34 = vld [vmem:[#allocation6 + $0x1b8] sm:$0xff] }
  0x1c   :  { %268 = vmatpush.msrb.mxu3 %v97_v10  ;;  %397 = vmatpush.msrb.mxu0 %v2169_v11  ;;  %v76_v35 = vld [vmem:[%s3134_s0 + $0x10] sm:$0xff]  ;;  %v2221_v36 = vld [vmem:[#allocation6 + $0x188] sm:$0xff]  ;;  %v2226_v37 = vld [vmem:[#allocation6 + $0x120] sm:$0xff] }
  0x1d   :  { %187 = vmatpush.msrb.mxu1 %v91_v12  ;;  %228 = vmatpush.msrb.mxu2 %v92_v13  ;;  %v2231_v38 = vld [vmem:[#allocation6 + $0x168] sm:$0xff]  ;;  %v2233_v39 = vld [vmem:[#allocation6 + $0x198] sm:$0xff]  ;;  %v2237_v40 = vld [vmem:[#allocation6 + $0x100] sm:$0xff] }
  0x1e   :  { %269 = vmatpush.msrb.mxu3 %v93_v14  ;;  %398 = vmatpush.msrb.mxu0 %v2175_v15  ;;  %v2239_v41 = vld [vmem:[#allocation6 + $0x1b0] sm:$0xff]  ;;  %v2243_v42 = vld [vmem:[#allocation6 + $0x148] sm:$0xff]  ;;  %v2245_v43 = vld [vmem:[#allocation6 + $0x178] sm:$0xff] }
  0x1f   :  { %188 = vmatpush.msrb.mxu1 %v87_v16  ;;  %229 = vmatpush.msrb.mxu2 %v88_v17  ;;  %v2248_v44 = vld [vmem:[#allocation6 + $0xe0] sm:$0xff]  ;;  %v2251_v45 = vld [vmem:[#allocation6 + $0x190] sm:$0xff]  ;;  %v2255_v46 = vld [vmem:[#allocation6 + $0x128] sm:$0xff] }
  0x20   :  { %270 = vmatpush.msrb.mxu3 %v89_v18  ;;  %399 = vmatpush.msrb.mxu0 %v2178_v19  ;;  %v2257_v47 = vld [vmem:[#allocation6 + $0x158] sm:$0xff]  ;;  %v2264_v49 = vld [vmem:[#allocation6 + $0x170] sm:$0xff]  ;;  %v2268_v50 = vld [vmem:[#allocation6 + $0xc0] sm:$0xff] }
  0x21   :  { %189 = vmatpush.msrb.mxu1 %v83_v20  ;;  %230 = vmatpush.msrb.mxu2 %v84_v21  ;;  %v77_v48 = vld [vmem:[%s3134_s0 + $0x18] sm:$0xff]  ;;  %v2273_v51 = vld [vmem:[#allocation6 + $0x108] sm:$0xff]  ;;  %v2280_v53 = vld [vmem:[#allocation6 + $0xa0] sm:$0xff]  ;;  %v3144_v21 = vmov 0.0  }
  0x22   :  { %271 = vmatpush.msrb.mxu3 %v85_v22  ;;  %1687 = vmatmul.msk.f32.gmra.mxu0 %vm108_vm0, %v75_v23  ;;  %v2275_v52 = vld [vmem:[#allocation6 + $0x138] sm:$0xff]  ;;  %3243 = vst [vmem:[#allocation17_spill] sm:$0xff] %v2280_v53  ;;  %v2282_v54 = vld [vmem:[#allocation6 + $0x150] sm:$0xff]  ;;  %v2286_v55 = vld [vmem:[#allocation6 + $0xe8] sm:$0xff] }
  0x23   :  { %1694 = vmatmul.msk.f32.vlgmr.msrb.gmra.mxu1 %vm108_vm0, %v74_v4  ;;  %1702 = vmatmul.msk.f32.vlgmr.msrb.gmra.mxu2 %vm108_vm0, %v74_v4  ;;  %v2288_v56 = vld [vmem:[#allocation6 + $0x118] sm:$0xff]  ;;  %v2290_v57 = vld [vmem:[#allocation6 + $0x80] sm:$0xff]  ;;  %v2294_v58 = vld [vmem:[#allocation6 + $0x130] sm:$0xff] }
  0x24   :  { %1710 = vmatmul.msk.f32.vlgmr.msrb.gmra.mxu3 %vm108_vm0, %v74_v4  ;;  %417 = vmatpush.msra.mxu1 %v2185_v24  ;;  %3244 = vst [vmem:[#allocation18_spill] sm:$0xff] %v2290_v57  ;;  %v2298_v59 = vld [vmem:[#allocation6 + $0xc8] sm:$0xff]  ;;  %v2300_v60 = vld [vmem:[#allocation6 + $0xf8] sm:$0xff]  ;;  %v78_v61 = vld [vmem:[%s3134_s0 + $0x20] sm:$0xff] }
  0x25   :  { %457 = vmatpush.msra.mxu3 %v2188_v25  ;;  %400 = vmatpush.msrb.mxu0 %v2190_v26  ;;  %v2307_v62 = vld [vmem:[#allocation6 + $0x110] sm:$0xff]  ;;  %v2311_v63 = vld [vmem:[#allocation6 + $0x60] sm:$0xff]  ;;  %v2316_v0 = vld [vmem:[#allocation6 + $0xa8] sm:$0xff] }
  0x26   :  { %418 = vmatpush.msra.mxu1 %v2194_v27  ;;  %437 = vmatpush.msra.mxu2 %v2196_v28  ;;  %3245 = vst [vmem:[#allocation19_spill] sm:$0xff] %v2311_v63  ;;  %v2318_v1 = vld [vmem:[#allocation6 + $0xd8] sm:$0xff]  ;;  %v2323_v2 = vld [vmem:[#allocation6 + $0x40] sm:$0xff]  ;;  %v2325_v3 = vld [vmem:[#allocation6 + $0xf0] sm:$0xff] }
  0x27   :  { %401 = vmatpush.msrb.mxu0 %v2200_v29  ;;  %458 = vmatpush.msra.mxu3 %v2202_v30  ;;  %3246 = vst [vmem:[#allocation20_spill] sm:$0xff] %v2316_v0  ;;  %v2329_v4 = vld [vmem:[#allocation6 + $0x88] sm:$0xff]  ;;  %v2331_v8 = vld [vmem:[#allocation6 + $0xb8] sm:$0xff]  ;;  %v2333_v9 = vld [vmem:[#allocation6 + $0x20] sm:$0xff] }
  0x28   :  { %419 = vmatpush.msra.mxu1 %v2206_v31  ;;  %438 = vmatpush.msra.mxu2 %v2208_v32  ;;  %3247 = vst [vmem:[#allocation21_spill] sm:$0xff] %v2318_v1  ;;  %v2337_v10 = vld [vmem:[#allocation6 + $0xd0] sm:$0xff]  ;;  %v2341_v12 = vld [vmem:[#allocation6 + $0x68] sm:$0xff]  ;;  %v2343_v13 = vld [vmem:[#allocation6 + $0x98] sm:$0xff] }
  0x29   :  { %402 = vmatpush.msrb.mxu0 %v2211_v33  ;;  %459 = vmatpush.msra.mxu3 %v2213_v34  ;;  %3248 = vst [vmem:[#allocation22_spill] sm:$0xff] %v2323_v2  ;;  %v2345_v14 = vld [vmem:[#allocation6] sm:$0xff]  ;;  %v2349_v16 = vld [vmem:[#allocation6 + $0xb0] sm:$0xff]  ;;  %v2356_v17 = vld [vmem:[#allocation6 + $0x48] sm:$0xff] }
  0x2a   :  { %1688 = vmatmul.msk.f32.gmra.mxu0 %vm108_vm0, %v76_v35  ;;  %420 = vmatpush.msra.mxu1 %v2221_v36  ;;  %3249 = vst [vmem:[#allocation23_spill] sm:$0xff] %v2329_v4  ;;  %v2359_v18 = vld [vmem:[#allocation6 + $0x78] sm:$0xff]  ;;  %v2363_v20 = vld [vmem:[#allocation6 + $0x90] sm:$0xff]  ;;  %v2367_v22 = vld [vmem:[#allocation6 + $0x28] sm:$0xff] }
  0x2b   :  { %1695 = vmatmul.msk.f32.gmra.mxu1 %vm108_vm0, %v75_v23  ;;  %1703 = vmatmul.msk.f32.gmra.mxu2 %vm108_vm0, %v75_v23  ;;  %3250 = vst [vmem:[#allocation24_spill] sm:$0xff] %v2331_v8 }
  0x2c   :  { %1711 = vmatmul.msk.f32.gmra.mxu3 %vm108_vm0, %v75_v23  ;;  %403 = vmatpush.msrb.mxu0 %v2226_v37  ;;  %3251 = vst [vmem:[#allocation25_spill] sm:$0xff] %v2333_v9  ;;  %v2369_v23 = vld [vmem:[#allocation6 + $0x58] sm:$0xff] }
  0x2d   :  { %421 = vmatpush.msra.mxu1 %v2231_v38  ;;  %460 = vmatpush.msra.mxu3 %v2233_v39  ;;  %3252 = vst [vmem:[#allocation26_spill] sm:$0xff] %v2337_v10 }
  0x2e   :  { %404 = vmatpush.msrb.mxu0 %v2237_v40  ;;  %439 = vmatpush.msra.mxu2 %v2239_v41  ;;  %3253 = vst [vmem:[#allocation27_spill] sm:$0xff] %v2341_v12 }
  0x2f   :  { %422 = vmatpush.msra.mxu1 %v2243_v42  ;;  %461 = vmatpush.msra.mxu3 %v2245_v43  ;;  %3254 = vst [vmem:[#allocation28_spill] sm:$0xff] %v2343_v13 }
  0x30   :  { %405 = vmatpush.msrb.mxu0 %v2248_v44  ;;  %440 = vmatpush.msra.mxu2 %v2251_v45  ;;  %3255 = vst [vmem:[#allocation29_spill] sm:$0xff] %v2345_v14 }
  0x31   :  { %423 = vmatpush.msra.mxu1 %v2255_v46  ;;  %462 = vmatpush.msra.mxu3 %v2257_v47  ;;  %3256 = vst [vmem:[#allocation30_spill] sm:$0xff] %v2349_v16 }
  0x32   :  { %1689 = vmatmul.msk.f32.gmra.mxu0 %vm108_vm0, %v77_v48  ;;  %441 = vmatpush.msra.mxu2 %v2264_v49  ;;  %3257 = vst [vmem:[#allocation31_spill] sm:$0xff] %v2356_v17 }
  0x33   :  { %1696 = vmatmul.msk.f32.gmra.mxu1 %vm108_vm0, %v76_v35  ;;  %1704 = vmatmul.msk.f32.gmra.mxu2 %vm108_vm0, %v76_v35  ;;  %3258 = vst [vmem:[#allocation32_spill] sm:$0xff] %v2359_v18 }
  0x34   :  { %1712 = vmatmul.msk.f32.gmra.mxu3 %vm108_vm0, %v76_v35  ;;  %406 = vmatpush.msrb.mxu0 %v2268_v50  ;;  %3259 = vst [vmem:[#allocation33_spill] sm:$0xff] %v2363_v20  ;;  %v2373_v35 = vld [vmem:[#allocation6 + $0x70] sm:$0xff] }
  0x35   :  { %424 = vmatpush.msra.mxu1 %v2273_v51  ;;  %463 = vmatpush.msra.mxu3 %v2275_v52  ;;  %3260 = vst [vmem:[#allocation34_spill] sm:$0xff] %v2367_v22 }
  0x36   :  { %407 = vmatpush.msrb.mxu0 %v2280_v53  ;;  %442 = vmatpush.msra.mxu2 %v2282_v54  ;;  %3261 = vst [vmem:[#allocation35_spill] sm:$0xff] %v2369_v23 }
  0x37   :  { %425 = vmatpush.msra.mxu1 %v2286_v55  ;;  %464 = vmatpush.msra.mxu3 %v2288_v56  ;;  %3262 = vst [vmem:[#allocation36_spill] sm:$0xff] %v2373_v35 }
  0x38   :  { %408 = vmatpush.msrb.mxu0 %v2290_v57  ;;  %443 = vmatpush.msra.mxu2 %v2294_v58 }
  0x39   :  { %426 = vmatpush.msra.mxu1 %v2298_v59  ;;  %465 = vmatpush.msra.mxu3 %v2300_v60 }
  0x3a   :  { %1690 = vmatmul.msk.f32.gmra.mxu0 %vm108_vm0, %v78_v61  ;;  %444 = vmatpush.msra.mxu2 %v2307_v62 }
  0x3b   :  { %1697 = vmatmul.msk.f32.gmra.mxu1 %vm108_vm0, %v77_v48  ;;  %1705 = vmatmul.msk.f32.gmra.mxu2 %vm108_vm0, %v77_v48 }
  0x3c   :  { %1713 = vmatmul.msk.f32.gmra.mxu3 %vm108_vm0, %v77_v48  ;;  %409 = vmatpush.msrb.mxu0 %v2311_v63  ;;  %v2376_v48 = vld [vmem:[#allocation6 + $0x8] sm:$0xff] }
  0x3d   :  { %427 = vmatpush.msra.mxu1 %v2316_v0  ;;  %466 = vmatpush.msra.mxu3 %v2318_v1  ;;  %3263 = vst [vmem:[#allocation37_spill] sm:$0xff] %v2376_v48 }
  0x3e   :  { %410 = vmatpush.msrb.mxu0 %v2323_v2  ;;  %445 = vmatpush.msra.mxu2 %v2325_v3 }
  0x3f   :  { %428 = vmatpush.msra.mxu1 %v2329_v4  ;;  %467 = vmatpush.msra.mxu3 %v2331_v8 }
  0x40   :  { %411 = vmatpush.msrb.mxu0 %v2333_v9  ;;  %446 = vmatpush.msra.mxu2 %v2337_v10  ;;  %v2392_v9 = vld [vmem:[#allocation6 + $0x18] sm:$0xff] }
  0x41   :  { %429 = vmatpush.msra.mxu1 %v2341_v12  ;;  %468 = vmatpush.msra.mxu3 %v2343_v13  ;;  %3267 = vst [vmem:[#allocation41_spill] sm:$0xff] %v2392_v9 }
  0x42   :  { %412 = vmatpush.msrb.mxu0 %v2345_v14  ;;  %447 = vmatpush.msra.mxu2 %v2349_v16  ;;  %v2378_v14 = vld [vmem:[#allocation6 + $0x38] sm:$0xff] }
  0x43   :  { %1698 = vmatmul.msk.f32.gmra.mxu1 %vm108_vm0, %v78_v61  ;;  %1706 = vmatmul.msk.f32.gmra.mxu2 %vm108_vm0, %v78_v61  ;;  %3264 = vst [vmem:[#allocation38_spill] sm:$0xff] %v2378_v14 }
  0x44   :  { %1714 = vmatmul.msk.f32.gmra.mxu3 %vm108_vm0, %v78_v61  ;;  %413 = vmatmul.f32.vlgmr.msrb.gmra.mxu0 %v3144_v21  ;;  %v2383_v61 = vld [vmem:[#allocation6 + $0x50] sm:$0xff] }
  0x45   :  { %430 = vmatpush.msra.mxu1 %v2356_v17  ;;  %469 = vmatpush.msra.mxu3 %v2359_v18  ;;  %3265 = vst [vmem:[#allocation39_spill] sm:$0xff] %v2383_v61  ;;  %v2388_v21 = vld [vmem:[#allocation6 + $0x30] sm:$0xff] }
  0x46   :  { %448 = vmatpush.msra.mxu2 %v2363_v20  ;;  %548 = vmatpush.msra.mxu0 %v2169_v11  ;;  %3266 = vst [vmem:[#allocation40_spill] sm:$0xff] %v2388_v21  ;;  %v2399_v11 = vld [vmem:[#allocation6 + $0x10] sm:$0xff] }
  0x47   :  { %431 = vmatpush.msra.mxu1 %v2367_v22  ;;  %470 = vmatpush.msra.mxu3 %v2369_v23  ;;  %3268 = vst [vmem:[#allocation42_spill] sm:$0xff] %v2399_v11 }
  0x48   :  { %449 = vmatpush.msra.mxu2 %v2373_v35  ;;  %549 = vmatpush.msra.mxu0 %v2175_v15 }
  0x49   :  { %432 = vmatpush.msra.mxu1 %v2376_v48  ;;  %471 = vmatpush.msra.mxu3 %v2378_v14 }
  0x4a   :  { %450 = vmatpush.msra.mxu2 %v2383_v61  ;;  %550 = vmatpush.msra.mxu0 %v2178_v19 }
  0x4b   :  { %568 = vmatpush.msrb.mxu1 %v2185_v24  ;;  %1707 = vmatmul.msk.f32.gmra.mxu2 %vm108_vm0, %v2154_v5 }
  0x4c   :  { %1699 = vmatmul.msk.f32.gmra.mxu1 %vm108_vm0, %v2154_v5  ;;  %1715 = vmatmul.msk.f32.gmra.mxu3 %vm108_vm0, %v2154_v5  ;;  %v3269_v5 = vmov 0.0  }
  0x4d   :  { %451 = vmatpush.msra.mxu2 %v2388_v21  ;;  %472 = vmatpush.msra.mxu3 %v2392_v9 }
  0x4e   :  { %569 = vmatpush.msrb.mxu1 %v2194_v27  ;;  %551 = vmatpush.msra.mxu0 %v2190_v26 }
  0x4f   :  { %452 = vmatpush.msra.mxu2 %v2399_v11  ;;  %608 = vmatpush.msrb.mxu3 %v2188_v25 }
  0x50   :  { %570 = vmatpush.msrb.mxu1 %v2206_v31  ;;  %552 = vmatpush.msra.mxu0 %v2200_v29 }
  0x51   :  { %588 = vmatpush.msrb.mxu2 %v2196_v28  ;;  %609 = vmatpush.msrb.mxu3 %v2202_v30 }
  0x52   :  { %571 = vmatpush.msrb.mxu1 %v2221_v36  ;;  %553 = vmatpush.msra.mxu0 %v2211_v33 }
  0x53   :  { %589 = vmatpush.msrb.mxu2 %v2208_v32  ;;  %610 = vmatpush.msrb.mxu3 %v2213_v34 }
  0x54   :  { %1700 = vmatmul.msk.f32.gmra.mxu1 %vm108_vm0, %v2159_v6  ;;  %1708 = vmatmul.msk.f32.gmra.mxu2 %vm108_vm0, %v2159_v6 }
  0x55   :  { %1716 = vmatmul.msk.f32.gmra.mxu3 %vm108_vm0, %v2159_v6  ;;  %590 = vmatpush.msrb.mxu2 %v2239_v41  ;;  %v3270_v6 = vld [vmem:[#allocation25_spill] sm:$0xff] }
  0x56   :  { %611 = vmatpush.msrb.mxu3 %v2233_v39  ;;  %572 = vmatpush.msrb.mxu1 %v2231_v38 }
  0x57   :  { %591 = vmatpush.msrb.mxu2 %v2251_v45  ;;  %554 = vmatpush.msra.mxu0 %v2226_v37 }
  0x58   :  { %612 = vmatpush.msrb.mxu3 %v2245_v43  ;;  %573 = vmatpush.msrb.mxu1 %v2243_v42 }
  0x59   :  { %592 = vmatpush.msrb.mxu2 %v2264_v49  ;;  %555 = vmatpush.msra.mxu0 %v2237_v40 }
  0x5a   :  { %613 = vmatpush.msrb.mxu3 %v2257_v47  ;;  %574 = vmatpush.msrb.mxu1 %v2255_v46 }
  0x5b   :  { %593 = vmatpush.msrb.mxu2 %v2282_v54  ;;  %556 = vmatpush.msra.mxu0 %v2248_v44 }
  0x5c   :  { %1701 = vmatmul.msk.f32.gmra.mxu1 %vm108_vm0, %v2164_v7  ;;  %1709 = vmatmul.msk.f32.gmra.mxu2 %vm108_vm0, %v2164_v7 }
  0x5d   :  { %1717 = vmatmul.msk.f32.gmra.mxu3 %vm108_vm0, %v2164_v7  ;;  %594 = vmatpush.msrb.mxu2 %v2294_v58  ;;  %v3271_v7 = vld [vmem:[#allocation29_spill] sm:$0xff] }
  0x5e   :  { %614 = vmatpush.msrb.mxu3 %v2275_v52  ;;  %575 = vmatpush.msrb.mxu1 %v2273_v51 }
  0x5f   :  { %595 = vmatpush.msrb.mxu2 %v2307_v62  ;;  %557 = vmatpush.msra.mxu0 %v2268_v50 }
  0x60   :  { %615 = vmatpush.msrb.mxu3 %v2288_v56  ;;  %576 = vmatpush.msrb.mxu1 %v2286_v55 }
  0x61   :  { %596 = vmatpush.msrb.mxu2 %v2325_v3  ;;  %558 = vmatpush.msra.mxu0 %v2280_v53 }
  0x62   :  { %616 = vmatpush.msrb.mxu3 %v2300_v60  ;;  %577 = vmatpush.msrb.mxu1 %v2298_v59 }
  0x63   :  { %597 = vmatpush.msrb.mxu2 %v2337_v10  ;;  %559 = vmatpush.msra.mxu0 %v2290_v57 }
  0x64   :  { %433 = vmatmul.f32.vlgmr.msra.gmra.mxu1 %v3269_v5  ;;  %453 = vmatmul.f32.vlgmr.msra.gmra.mxu2 %v3269_v5 }
  0x65   :  { %473 = vmatmul.f32.vlgmr.msra.gmra.mxu3 %v3269_v5  ;;  %578 = vmatpush.msrb.mxu1 %v2316_v0  ;;  %v3272_v5 = vld [vmem:[#allocation16_spill] sm:$0xff] }
  0x66   :  { %617 = vmatpush.msrb.mxu3 %v2318_v1  ;;  %598 = vmatpush.msrb.mxu2 %v2349_v16 }
  0x67   :  { %579 = vmatpush.msrb.mxu1 %v2329_v4  ;;  %560 = vmatpush.msra.mxu0 %v2311_v63 }
  0x68   :  { %618 = vmatpush.msrb.mxu3 %v2331_v8  ;;  %599 = vmatpush.msrb.mxu2 %v2363_v20 }
  0x69   :  { %580 = vmatpush.msrb.mxu1 %v2341_v12  ;;  %561 = vmatpush.msra.mxu0 %v2323_v2 }
  0x6a   :  { %619 = vmatpush.msrb.mxu3 %v2343_v13  ;;  %600 = vmatpush.msrb.mxu2 %v2373_v35 }
  0x6b   :  { %581 = vmatpush.msrb.mxu1 %v2356_v17  ;;  %562 = vmatpush.msra.mxu0 %v3270_v6 }
  0x6c   :  { %620 = vmatpush.msrb.mxu3 %v2359_v18  ;;  %601 = vmatpush.msrb.mxu2 %v2383_v61 }
  0x6d   :  { %582 = vmatpush.msrb.mxu1 %v2367_v22  ;;  %563 = vmatpush.msra.mxu0 %v3271_v7 }
  0x6e   :  { %621 = vmatpush.msrb.mxu3 %v2369_v23  ;;  %602 = vmatpush.msrb.mxu2 %v2388_v21 }
  0x6f   :  { %583 = vmatpush.msrb.mxu1 %v2376_v48  ;;  %699 = vmatpush.msrb.mxu0 %v3272_v5 }
  0x70   :  { %622 = vmatpush.msrb.mxu3 %v2378_v14  ;;  %603 = vmatpush.msrb.mxu2 %v2399_v11 }
  0x71   :  { %719 = vmatpush.msra.mxu1 %v2185_v24  ;;  %700 = vmatpush.msrb.mxu0 %v2175_v15 }
  0x72   :  { %623 = vmatpush.msrb.mxu3 %v2392_v9  ;;  %739 = vmatpush.msra.mxu2 %v2196_v28 }
  0x73   :  { %720 = vmatpush.msra.mxu1 %v2194_v27  ;;  %701 = vmatpush.msrb.mxu0 %v2178_v19 }
  0x74   :  { %759 = vmatpush.msra.mxu3 %v2188_v25  ;;  %740 = vmatpush.msra.mxu2 %v2208_v32 }
  0x75   :  { %721 = vmatpush.msra.mxu1 %v2206_v31  ;;  %702 = vmatpush.msrb.mxu0 %v2190_v26 }
  0x76   :  { %760 = vmatpush.msra.mxu3 %v2202_v30  ;;  %741 = vmatpush.msra.mxu2 %v2239_v41 }
  0x77   :  { %722 = vmatpush.msra.mxu1 %v2221_v36  ;;  %703 = vmatpush.msrb.mxu0 %v2200_v29 }
  0x78   :  { %761 = vmatpush.msra.mxu3 %v2213_v34  ;;  %742 = vmatpush.msra.mxu2 %v2251_v45 }
  0x79   :  { %723 = vmatpush.msra.mxu1 %v2231_v38  ;;  %704 = vmatpush.msrb.mxu0 %v2211_v33 }
  0x7a   :  { %762 = vmatpush.msra.mxu3 %v2233_v39  ;;  %743 = vmatpush.msra.mxu2 %v2264_v49 }
  0x7b   :  { %724 = vmatpush.msra.mxu1 %v2243_v42  ;;  %705 = vmatpush.msrb.mxu0 %v2226_v37 }
  0x7c   :  { %763 = vmatpush.msra.mxu3 %v2245_v43  ;;  %744 = vmatpush.msra.mxu2 %v2282_v54 }
  0x7d   :  { %725 = vmatpush.msra.mxu1 %v2255_v46  ;;  %706 = vmatpush.msrb.mxu0 %v2237_v40 }
  0x7e   :  { %764 = vmatpush.msra.mxu3 %v2257_v47  ;;  %745 = vmatpush.msra.mxu2 %v2294_v58 }
  0x7f   :  { %726 = vmatpush.msra.mxu1 %v2273_v51  ;;  %707 = vmatpush.msrb.mxu0 %v2248_v44 }
  0x80   :  { %765 = vmatpush.msra.mxu3 %v2275_v52  ;;  %746 = vmatpush.msra.mxu2 %v2307_v62 }
  0x81   :  { %727 = vmatpush.msra.mxu1 %v2286_v55  ;;  %708 = vmatpush.msrb.mxu0 %v2268_v50 }
  0x82   :  { %766 = vmatpush.msra.mxu3 %v2288_v56  ;;  %747 = vmatpush.msra.mxu2 %v2325_v3 }
  0x83   :  { %728 = vmatpush.msra.mxu1 %v2298_v59  ;;  %709 = vmatpush.msrb.mxu0 %v2280_v53 }
  0x84   :  { %767 = vmatpush.msra.mxu3 %v2300_v60  ;;  %748 = vmatpush.msra.mxu2 %v2337_v10 }
  0x85   :  { %729 = vmatpush.msra.mxu1 %v2316_v0  ;;  %710 = vmatpush.msrb.mxu0 %v2290_v57 }
  0x86   :  { %768 = vmatpush.msra.mxu3 %v2318_v1  ;;  %749 = vmatpush.msra.mxu2 %v2349_v16 }
  0x87   :  { %730 = vmatpush.msra.mxu1 %v2329_v4  ;;  %711 = vmatpush.msrb.mxu0 %v2311_v63 }
  0x88   :  { %769 = vmatpush.msra.mxu3 %v2331_v8  ;;  %750 = vmatpush.msra.mxu2 %v2363_v20 }
  0x89   :  { %731 = vmatpush.msra.mxu1 %v2341_v12  ;;  %712 = vmatpush.msrb.mxu0 %v2323_v2 }
  0x8a   :  { %770 = vmatpush.msra.mxu3 %v2343_v13  ;;  %751 = vmatpush.msra.mxu2 %v2373_v35 }
  0x8b   :  { %732 = vmatpush.msra.mxu1 %v2356_v17  ;;  %713 = vmatpush.msrb.mxu0 %v3270_v6  ;;  %v98_v17 = vld [vmem:[%s3137_s3] sm:$0xf] }
  0x8c   :  { %771 = vmatpush.msra.mxu3 %v2359_v18  ;;  %752 = vmatpush.msra.mxu2 %v2383_v61  ;;  %v2565_v20 = vperm.slane %v98_v17, 2 }
  0x8d   :  { %733 = vmatpush.msra.mxu1 %v2367_v22  ;;  %714 = vmatpush.msrb.mxu0 %v3271_v7 }
  0x8e   :  { %772 = vmatpush.msra.mxu3 %v2369_v23  ;;  %753 = vmatpush.msra.mxu2 %v2388_v21  ;;  %v100_v23 = vperm.slane %v98_v17, 0 }
  0x8f   :  { %734 = vmatpush.msra.mxu1 %v2376_v48 }
  0x90   :  { %773 = vmatpush.msra.mxu3 %v2378_v14  ;;  %754 = vmatpush.msra.mxu2 %v2399_v11  ;;  %v101_v11 = vperm.slane %v98_v17, 1 }
  0x92   :  { %774 = vmatpush.msra.mxu3 %v2392_v9 }
  0x96   :  { %v150_v6 = vpop.f32.mrf.mxu0  ;;  %v165_v61 = vpop.f32.mrf.mxu1 }
  0x97   :  { %v2549_v22 = vadd.f32 %v165_v61, %v100_v23 }
  0x99   :  { %3273 = vst [vmem:[#allocation16_spill] sm:$0xff] %v2549_v22 }
  0x9d   :  { %v168_v21 = vpop.f32.mrf.mxu2  ;;  %v171_v2 = vpop.f32.mrf.mxu3 }
  0x9e   :  { %v2551_v14 = vadd.f32 %v168_v21, %v100_v23  ;;  %v2553_v7 = vadd.f32 %v171_v2, %v100_v23  ;;  %v103_v21 = vperm.slane %v98_v17, 3 }
  0x9f   :  { %v153_v48 = vpop.f32.mrf.mxu0 }
  0xa0   :  { %3274 = vst [vmem:[#allocation43_spill] sm:$0xff] %v2551_v14  ;;  %v2555_v18 = vadd.f32 %v153_v48, %v100_v23  ;;  %v191_v35 = vpop.f32.mrf.mxu1 }
  0xa1   :  { %3275 = vst [vmem:[#allocation44_spill] sm:$0xff] %v2553_v7 }
  0xa2   :  { %3276 = vst [vmem:[#allocation45_spill] sm:$0xff] %v2555_v18 }
  0xa6   :  { %v2557_v12 = vpop.f32.mrf.mxu2 }
  0xa7   :  { %v2559_v63 = vpop.f32.mrf.mxu3  ;;  %v156_v9 = vpop.f32.mrf.mxu0 }
  0xa8   :  { %v2561_v13 = vadd.f32 %v156_v9, %v100_v23  ;;  %v194_v61 = vpop.f32.mrf.mxu1 }
  0xa9   :  { %v2563_v22 = vadd.f32 %v194_v61, %v101_v11 }
  0xaa   :  { %3277 = vst [vmem:[#allocation46_spill] sm:$0xff] %v2561_v13 }
  0xab   :  { %3278 = vst [vmem:[#allocation47_spill] sm:$0xff] %v2563_v22 }
  0xae   :  { %v235_v2 = vpop.f32.mrf.mxu2 }
  0xaf   :  { %v2568_v7 = vadd.f32 %v235_v2, %v2565_v20  ;;  %v276_v48 = vpop.f32.mrf.mxu3  ;;  %v159_v14 = vpop.f32.mrf.mxu0 }
  0xb0   :  { %v2570_v18 = vadd.f32 %v276_v48, %v103_v21  ;;  %v2572_v4 = vadd.f32 %v159_v14, %v100_v23  ;;  %v197_v57 = vpop.f32.mrf.mxu1 }
  0xb1   :  { %3279 = vst [vmem:[#allocation48_spill] sm:$0xff] %v2568_v7  ;;  %v2574_v8 = vadd.f32 %v197_v57, %v101_v11 }
  0xb2   :  { %3280 = vst [vmem:[#allocation49_spill] sm:$0xff] %v2570_v18 }
  0xb3   :  { %3281 = vst [vmem:[#allocation50_spill] sm:$0xff] %v2572_v4 }
  0xb4   :  { %3282 = vst [vmem:[#allocation51_spill] sm:$0xff] %v2574_v8 }
  0xb6   :  { %v238_v9 = vpop.f32.mrf.mxu2 }
  0xb7   :  { %v2577_v61 = vadd.f32 %v238_v9, %v2565_v20  ;;  %v279_v13 = vpop.f32.mrf.mxu3  ;;  %v162_v22 = vpop.f32.mrf.mxu0 }
  0xb8   :  { %v2579_v17 = vadd.f32 %v279_v13, %v103_v21  ;;  %v2581_v16 = vadd.f32 %v162_v22, %v100_v23  ;;  %v200_v2 = vpop.f32.mrf.mxu1 }
  0xb9   :  { %3283 = vst [vmem:[#allocation52_spill] sm:$0xff] %v2577_v61  ;;  %v2583_v7 = vadd.f32 %v200_v2, %v101_v11 }
  0xba   :  { %3284 = vst [vmem:[#allocation53_spill] sm:$0xff] %v2579_v17  ;;  %v151_v17 = vadd.f32 %v150_v6, %v100_v23 }
  0xbb   :  { %3285 = vst [vmem:[#allocation54_spill] sm:$0xff] %v2581_v16 }
  0xbc   :  { %3286 = vst [vmem:[#allocation55_spill] sm:$0xff] %v2583_v7 }
  0xbe   :  { %v241_v48 = vpop.f32.mrf.mxu2 }
  0xbf   :  { %v2586_v14 = vadd.f32 %v241_v48, %v2565_v20  ;;  %v282_v4 = vpop.f32.mrf.mxu3 }
  0xc0   :  { %v2588_v57 = vadd.f32 %v282_v4, %v103_v21  ;;  %v203_v8 = vpop.f32.mrf.mxu1 }
  0xc1   :  { %3287 = vst [vmem:[#allocation56_spill] sm:$0xff] %v2586_v14  ;;  %v2590_v18 = vadd.f32 %v203_v8, %v101_v11  ;;  %v414_v7 = vpop.f32.mrf.mxu0 }
  0xc2   :  { %3288 = vst [vmem:[#allocation57_spill] sm:$0xff] %v2588_v57  ;;  %v477_v48 = vadd.f32 %v414_v7, %v151_v17 }
  0xc3   :  { %3289 = vst [vmem:[#allocation58_spill] sm:$0xff] %v2590_v18 }
  0xc4   :  { %v1718_v0 = vmul.f32 -1.442695, %v477_v48 }
  0xc6   :  { %v244_v9 = vpop.f32.mrf.mxu2  ;;  %1765 = vpow2.f32 %v1718_v0 }
  0xc7   :  { %v2593_v61 = vadd.f32 %v244_v9, %v2565_v20  ;;  %v285_v13 = vpop.f32.mrf.mxu3 }
  0xc8   :  { %v2595_v22 = vadd.f32 %v285_v13, %v103_v21 }
  0xc9   :  { %3290 = vst [vmem:[#allocation59_spill] sm:$0xff] %v2593_v61  ;;  %v206_v16 = vpop.f32.mrf.mxu1 }
  0xca   :  { %3291 = vst [vmem:[#allocation60_spill] sm:$0xff] %v2595_v22  ;;  %v2597_v2 = vadd.f32 %v206_v16, %v101_v11 }
  0xcc   :  { %3292 = vst [vmem:[#allocation61_spill] sm:$0xff] %v2597_v2  ;;  %v1766_v7 = vpop.eup %1765 }
  0xcd   :  { %v484_v17 = vadd.f32 1.0, %v1766_v7 }
  0xce   :  { %v247_v14 = vpop.f32.mrf.mxu2 }
  0xcf   :  { %v2600_v4 = vadd.f32 %v247_v14, %v2565_v20  ;;  %v288_v57 = vpop.f32.mrf.mxu3  ;;  %1767 = vrcp.f32 %v484_v17  ;;  %vm490_vm2 = vweird.f32 %v484_v17 }
  0xd0   :  { %v2602_v8 = vadd.f32 %v288_v57, %v103_v21  ;;  %v192_v57 = vadd.f32 %v191_v35, %v101_v11 }
  0xd1   :  { %3293 = vst [vmem:[#allocation62_spill] sm:$0xff] %v2600_v4  ;;  %v209_v18 = vpop.f32.mrf.mxu1 }
  0xd2   :  { %3294 = vst [vmem:[#allocation63_spill] sm:$0xff] %v2602_v8  ;;  %v2604_v9 = vadd.f32 %v209_v18, %v101_v11 }
  0xd4   :  { %3295 = vst [vmem:[#allocation64_spill] sm:$0xff] %v2604_v9 }
  0xd7   :  { %v250_v13 = vpop.f32.mrf.mxu2 }
  0xd8   :  { %v2607_v61 = vadd.f32 %v250_v13, %v2565_v20  ;;  %v291_v16 = vpop.f32.mrf.mxu3 }
  0xd9   :  { %v2609_v2 = vadd.f32 %v291_v16, %v103_v21  ;;  %v212_v23 = vpop.f32.mrf.mxu1  ;;  %v274_v16 = vadd.f32 %v2559_v63, %v103_v21 }
  0xda   :  { %3296 = vst [vmem:[#allocation65_spill] sm:$0xff] %v2607_v61  ;;  %v2611_v6 = vadd.f32 %v212_v23, %v101_v11  ;;  %v1768_v23 = vpop.eup %1767 }
  0xdb   :  { %3297 = vst [vmem:[#allocation66_spill] sm:$0xff] %v2609_v2  ;;  %v486_v8 = vmul.f32 %v1768_v23, %v484_v17  ;;  %vm491_vm1 = vweird.f32 %v1768_v23 }
  0xdc   :  { %3298 = vst [vmem:[#allocation67_spill] sm:$0xff] %v2611_v6  ;;  %vm492_vm4 = vmor %vm490_vm2, %vm491_vm1 }
  0xdd   :  { %v487_v35 = vsub.f32 1.0, %v486_v8  ;;  %v494_v8 = vand.u32 2147483647, %v484_v17 }
  0xdf   :  { %v253_v14 = vpop.f32.mrf.mxu2  ;;  %vm495_vm7 = vcmp.eq.f32.partialorder %v494_v8, 8.507059e+37 }
  0xe0   :  { %v2614_v4 = vadd.f32 %v253_v14, %v2565_v20  ;;  %v294_v18 = vpop.f32.mrf.mxu3 }
  0xe1   :  { %v2616_v48 = vadd.f32 %v294_v18, %v103_v21  ;;  %v434_v0 = vpop.f32.mrf.mxu1  ;;  %v233_v18 = vadd.f32 %v2557_v12, %v2565_v20 }
  0xe2   :  { %3299 = vst [vmem:[#allocation68_spill] sm:$0xff] %v2614_v4  ;;  %v478_v9 = vadd.f32 %v434_v0, %v192_v57 }
  0xe3   :  { %3300 = vst [vmem:[#allocation69_spill] sm:$0xff] %v2616_v48 }
  0xe4   :  { %v1719_v13 = vmul.f32 -1.442695, %v478_v9  ;;  %v488_v9 = vmul.f32 %v1768_v23, %v487_v35 }
  0xe6   :  { %1769 = vpow2.f32 %v1719_v13 }
  0xe7   :  { %v454_v14 = vpop.f32.mrf.mxu2 }
  0xe8   :  { %v474_v61 = vpop.f32.mrf.mxu3  ;;  %v479_v0 = vadd.f32 %v454_v14, %v233_v18 }
  0xe9   :  { %v480_v6 = vadd.f32 %v474_v61, %v274_v16  ;;  %v489_v61 = vadd.f32 %v1768_v23, %v488_v9 }
  0xeb   :  { %v1720_v2 = vmul.f32 -1.442695, %v480_v6  ;;  %v493_v20 = vsel %vm492_vm4, %v1768_v23, %v489_v61 }
  0xec   :  { %v1770_v7 = vpop.eup %1769 }
  0xed   :  { %v503_v11 = vadd.f32 1.0, %v1770_v7  ;;  %1771 = vpow2.f32 %v1720_v2  ;;  %v496_v2 = vand.u32 2147483648, %v484_v17 }
  0xef   :  { %1773 = vrcp.f32 %v503_v11  ;;  %v515_v6 = vand.u32 2147483648, %v503_v11  ;;  %v513_v7 = vand.u32 2147483647, %v503_v11  ;;  %vm509_vm5 = vweird.f32 %v503_v11 }
  0xf1   :  { %v516_v18 = vor.u32 1.1754944e-38, %v515_v6  ;;  %vm514_vm8 = vcmp.eq.f32.partialorder %v513_v7, 8.507059e+37 }
  0xf3   :  { %v1772_v57 = vpop.eup %1771 }
  0xf4   :  { %v523_v13 = vadd.f32 1.0, %v1772_v57  ;;  %v497_v57 = vor.u32 1.1754944e-38, %v496_v2 }
  0xf5   :  { %v1774_v4 = vpop.eup %1773 }
  0xf6   :  { %v505_v63 = vmul.f32 %v1774_v4, %v503_v11  ;;  %1775 = vrcp.f32 %v523_v13  ;;  %vm510_vm3 = vweird.f32 %v1774_v4  ;;  %v535_v23 = vand.u32 2147483648, %v523_v13 }
  0xf7   :  { %1777 = vtanh.f32 %v479_v0  ;;  %vm511_vm6 = vmor %vm509_vm5, %vm510_vm3  ;;  %vm529_vm10 = vweird.f32 %v523_v13  ;;  %v533_v11 = vand.u32 2147483647, %v523_v13 }
  0xf8   :  { %v506_v21 = vsub.f32 1.0, %v505_v63  ;;  %v498_v63 = vsel %vm495_vm7, %v497_v57, %v493_v20  ;;  %v536_v6 = vor.u32 1.1754944e-38, %v535_v23  ;;  %v3330_v20 = vld [vmem:[#allocation48_spill] sm:$0xff] }
  0xf9   :  { %vm534_vm12 = vcmp.eq.f32.partialorder %v533_v11, 8.507059e+37 }
  0xfa   :  { %v507_v16 = vmul.f32 %v1774_v4, %v506_v21 }
  0xfc   :  { %v1776_v12 = vpop.eup %1775  ;;  %v508_v35 = vadd.f32 %v1774_v4, %v507_v16 }
  0xfd   :  { %v1778_v14 = vpop.eup %1777  ;;  %v525_v0 = vmul.f32 %v1776_v12, %v523_v13  ;;  %vm530_vm9 = vweird.f32 %v1776_v12 }
  0xfe   :  { %v512_v9 = vsel %vm511_vm6, %v1774_v4, %v508_v35  ;;  %v540_v17 = vmul.f32 %v1778_v14, %v498_v63  ;;  %vm531_vm11 = vmor %vm529_vm10, %vm530_vm9 }
  0xff   :  { %v517_v48 = vsel %vm514_vm8, %v516_v18, %v512_v9  ;;  %v526_v22 = vsub.f32 1.0, %v525_v0 }
 0x100   :  { %v539_v21 = vmul.f32 0.0, %v517_v48 }
 0x101   :  { %v527_v53 = vmul.f32 %v1776_v12, %v526_v22 }
 0x102   :  { %v2621_v1 = vadd.f32 %v540_v17, %v539_v21 }
 0x103   :  { %v528_v10 = vadd.f32 %v1776_v12, %v527_v53 }
 0x104   :  { %1779 = vtanh.f32 %v2621_v1 }
 0x105   :  { %v532_v61 = vsel %vm531_vm11, %v1776_v12, %v528_v10 }
 0x106   :  { %v537_v2 = vsel %vm534_vm12, %v536_v6, %v532_v61 }
 0x10a   :  { %v1780_v4 = vpop.eup %1779 }
 0x10b   :  { %v543_v16 = vmul.f32 %v1780_v4, %v537_v2 }
 0x10d   :  { %564 = vmatmul.f32.vlgmr.msra.gmra.mxu0 %v543_v16  ;;  %584 = vmatmul.f32.vlgmr.msrb.gmra.mxu1 %v543_v16 }
 0x10e   :  { %604 = vmatmul.f32.vlgmr.msrb.gmra.mxu2 %v543_v16  ;;  %624 = vmatmul.f32.vlgmr.msrb.gmra.mxu3 %v543_v16 }
 0x10f   :  { %850 = vmatpush.msra.mxu0 %v3272_v5  ;;  %870 = vmatpush.msrb.mxu1 %v2185_v24  ;;  %v3303_v24 = vld [vmem:[#allocation17_spill] sm:$0xff] }
 0x110   :  { %890 = vmatpush.msrb.mxu2 %v2196_v28  ;;  %910 = vmatpush.msrb.mxu3 %v2188_v25  ;;  %v3304_v25 = vld [vmem:[#allocation20_spill] sm:$0xff]  ;;  %v3307_v28 = vld [vmem:[#allocation18_spill] sm:$0xff] }
 0x111   :  { %851 = vmatpush.msra.mxu0 %v2175_v15  ;;  %871 = vmatpush.msrb.mxu1 %v2194_v27  ;;  %v3301_v15 = vld [vmem:[#allocation26_spill] sm:$0xff]  ;;  %v3306_v27 = vld [vmem:[#allocation24_spill] sm:$0xff] }
 0x112   :  { %891 = vmatpush.msrb.mxu2 %v2208_v32  ;;  %911 = vmatpush.msrb.mxu3 %v2202_v30  ;;  %v3309_v30 = vld [vmem:[#allocation33_spill] sm:$0xff]  ;;  %v3311_v32 = vld [vmem:[#allocation19_spill] sm:$0xff] }
 0x113   :  { %852 = vmatpush.msra.mxu0 %v2178_v19  ;;  %872 = vmatpush.msrb.mxu1 %v2206_v31  ;;  %v3302_v19 = vld [vmem:[#allocation21_spill] sm:$0xff]  ;;  %v3310_v31 = vld [vmem:[#allocation28_spill] sm:$0xff] }
 0x114   :  { %892 = vmatpush.msrb.mxu2 %v2239_v41  ;;  %912 = vmatpush.msrb.mxu3 %v2213_v34  ;;  %v3313_v34 = vld [vmem:[#allocation36_spill] sm:$0xff]  ;;  %v3319_v41 = vld [vmem:[#allocation25_spill] sm:$0xff] }
 0x115   :  { %853 = vmatpush.msra.mxu0 %v2190_v26  ;;  %873 = vmatpush.msrb.mxu1 %v2221_v36  ;;  %v3305_v26 = vld [vmem:[#allocation30_spill] sm:$0xff]  ;;  %v3314_v36 = vld [vmem:[#allocation32_spill] sm:$0xff] }
 0x116   :  { %893 = vmatpush.msrb.mxu2 %v2251_v45  ;;  %913 = vmatpush.msrb.mxu3 %v2233_v39  ;;  %v3317_v39 = vld [vmem:[#allocation39_spill] sm:$0xff]  ;;  %v3323_v45 = vld [vmem:[#allocation29_spill] sm:$0xff] }
 0x117   :  { %854 = vmatpush.msra.mxu0 %v2200_v29  ;;  %874 = vmatpush.msrb.mxu1 %v2231_v38  ;;  %v3308_v29 = vld [vmem:[#allocation23_spill] sm:$0xff] }
 0x118   :  { %894 = vmatpush.msrb.mxu2 %v2264_v49  ;;  %914 = vmatpush.msrb.mxu3 %v2245_v43  ;;  %v3316_v38 = vld [vmem:[#allocation31_spill] sm:$0xff]  ;;  %v3321_v43 = vld [vmem:[#allocation40_spill] sm:$0xff]  ;;  %v3326_v49 = vld [vmem:[#allocation41_spill] sm:$0xff] }
 0x119   :  { %855 = vmatpush.msra.mxu0 %v2211_v33  ;;  %875 = vmatpush.msrb.mxu1 %v2243_v42  ;;  %v3312_v33 = vld [vmem:[#allocation27_spill] sm:$0xff]  ;;  %v3320_v42 = vld [vmem:[#allocation34_spill] sm:$0xff] }
 0x11a   :  { %895 = vmatpush.msrb.mxu2 %v2282_v54  ;;  %915 = vmatpush.msrb.mxu3 %v2257_v47  ;;  %v3325_v47 = vld [vmem:[#allocation42_spill] sm:$0xff]  ;;  %v3328_v54 = vld [vmem:[#allocation47_spill] sm:$0xff] }
 0x11b   :  { %856 = vmatpush.msra.mxu0 %v2226_v37  ;;  %876 = vmatpush.msrb.mxu1 %v2255_v46  ;;  %v3315_v37 = vld [vmem:[#allocation22_spill] sm:$0xff]  ;;  %v3324_v46 = vld [vmem:[#allocation37_spill] sm:$0xff] }
 0x11c   :  { %896 = vmatpush.msrb.mxu2 %v2294_v58  ;;  %916 = vmatpush.msrb.mxu3 %v2275_v52  ;;  %v3327_v52 = vld [vmem:[#allocation45_spill] sm:$0xff] }
 0x11d   :  { %857 = vmatpush.msra.mxu0 %v2237_v40  ;;  %877 = vmatpush.msrb.mxu1 %v2273_v51  ;;  %v3318_v40 = vld [vmem:[#allocation35_spill] sm:$0xff] }
 0x11e   :  { %897 = vmatpush.msrb.mxu2 %v2307_v62  ;;  %917 = vmatpush.msrb.mxu3 %v2288_v56 }
 0x11f   :  { %858 = vmatpush.msra.mxu0 %v2248_v44  ;;  %878 = vmatpush.msrb.mxu1 %v2286_v55  ;;  %v3322_v44 = vld [vmem:[#allocation38_spill] sm:$0xff] }
 0x120   :  { %898 = vmatpush.msrb.mxu2 %v2325_v3  ;;  %918 = vmatpush.msrb.mxu3 %v2300_v60  ;;  %v3329_v60 = vld [vmem:[#allocation49_spill] sm:$0xff] }
 0x121   :  { %859 = vmatpush.msra.mxu0 %v2268_v50  ;;  %879 = vmatpush.msrb.mxu1 %v2298_v59 }
 0x122   :  { %899 = vmatpush.msrb.mxu2 %v3301_v15  ;;  %919 = vmatpush.msrb.mxu3 %v3302_v19 }
 0x123   :  { %860 = vmatpush.msra.mxu0 %v3303_v24  ;;  %880 = vmatpush.msrb.mxu1 %v3304_v25 }
 0x124   :  { %900 = vmatpush.msrb.mxu2 %v3305_v26  ;;  %920 = vmatpush.msrb.mxu3 %v3306_v27 }
 0x125   :  { %861 = vmatpush.msra.mxu0 %v3307_v28  ;;  %881 = vmatpush.msrb.mxu1 %v3308_v29 }
 0x126   :  { %901 = vmatpush.msrb.mxu2 %v3309_v30  ;;  %921 = vmatpush.msrb.mxu3 %v3310_v31 }
 0x127   :  { %862 = vmatpush.msra.mxu0 %v3311_v32  ;;  %882 = vmatpush.msrb.mxu1 %v3312_v33 }
 0x128   :  { %902 = vmatpush.msrb.mxu2 %v3313_v34  ;;  %922 = vmatpush.msrb.mxu3 %v3314_v36 }
 0x129   :  { %863 = vmatpush.msra.mxu0 %v3315_v37  ;;  %883 = vmatpush.msrb.mxu1 %v3316_v38 }
 0x12a   :  { %903 = vmatpush.msrb.mxu2 %v3317_v39  ;;  %923 = vmatpush.msrb.mxu3 %v3318_v40 }
 0x12b   :  { %864 = vmatpush.msra.mxu0 %v3319_v41  ;;  %884 = vmatpush.msrb.mxu1 %v3320_v42 }
 0x12c   :  { %904 = vmatpush.msrb.mxu2 %v3321_v43  ;;  %924 = vmatpush.msrb.mxu3 %v3322_v44 }
 0x12d   :  { %865 = vmatpush.msra.mxu0 %v3323_v45  ;;  %885 = vmatpush.msrb.mxu1 %v3324_v46 }
 0x12e   :  { %905 = vmatpush.msrb.mxu2 %v3325_v47  ;;  %925 = vmatpush.msrb.mxu3 %v3326_v49 }
 0x18a   :  { %v565_v50 = vpop.f32.mrf.mxu0  ;;  %v585_v51 = vpop.f32.mrf.mxu1 }
 0x18b   :  { %v628_v53 = vadd.f32 %v565_v50, %v3327_v52  ;;  %v629_v55 = vadd.f32 %v585_v51, %v3328_v54 }
 0x18d   :  { %v1721_v56 = vmul.f32 -1.442695, %v628_v53  ;;  %v1722_v58 = vmul.f32 -1.442695, %v629_v55 }
 0x18f   :  { %1781 = vpow2.f32 %v1721_v56 }
 0x190   :  { %1783 = vpow2.f32 %v1722_v58 }
 0x191   :  { %v625_v59 = vpop.f32.mrf.mxu3  ;;  %v605_v13 = vpop.f32.mrf.mxu2 }
 0x192   :  { %v631_v62 = vadd.f32 %v625_v59, %v3329_v60  ;;  %v630_v35 = vadd.f32 %v605_v13, %v3330_v20  ;;  %v2699_v59 = vld [vmem:[#allocation6 + $0x1e8] sm:$0xff]  ;;  %v2702_v60 = vld [vmem:[#allocation6 + $0x1f0] sm:$0xff] }
 0x193   :  { %v2723_v13 = vld [vmem:[#allocation6 + $0x1a8] sm:$0xff] }
 0x194   :  { %v1723_v3 = vmul.f32 -1.442695, %v631_v62  ;;  %v2705_v62 = vld [vmem:[#allocation6 + $0x1f8] sm:$0xff]  ;;  %v2735_v20 = vld [vmem:[#allocation6 + $0x188] sm:$0xff] }
 0x195   :  { %v1782_v10 = vpop.eup %1781 }
 0x196   :  { %v1784_v5 = vpop.eup %1783  ;;  %v635_v22 = vadd.f32 1.0, %v1782_v10  ;;  %1785 = vpow2.f32 %v1723_v3  ;;  %v2708_v3 = vld [vmem:[#allocation6 + $0x1c0] sm:$0xff]  ;;  %v2711_v10 = vld [vmem:[#allocation6 + $0x1c8] sm:$0xff] }
 0x197   :  { %v654_v48 = vadd.f32 1.0, %v1784_v5  ;;  %v2714_v5 = vld [vmem:[#allocation6 + $0x1d0] sm:$0xff] }
 0x198   :  { %1787 = vrcp.f32 %v635_v22  ;;  %v647_v63 = vand.u32 2147483648, %v635_v22  ;;  %v645_v23 = vand.u32 2147483647, %v635_v22  ;;  %vm641_vm15 = vweird.f32 %v635_v22 }
 0x199   :  { %1789 = vrcp.f32 %v654_v48  ;;  %v666_v21 = vand.u32 2147483648, %v654_v48  ;;  %v664_v61 = vand.u32 2147483647, %v654_v48  ;;  %vm660_vm0 = vweird.f32 %v654_v48 }
 0x19a   :  { %v648_v2 = vor.u32 1.1754944e-38, %v647_v63  ;;  %vm646_vm3 = vcmp.eq.f32.partialorder %v645_v23, 8.507059e+37  ;;  %v2756_v63 = vld [vmem:[#allocation6 + $0x140] sm:$0xff]  ;;  %v2765_v23 = vld [vmem:[#allocation6 + $0x158] sm:$0xff] }
 0x19b   :  { %v667_v24 = vor.u32 1.1754944e-38, %v666_v21  ;;  %vm665_vm4 = vcmp.eq.f32.partialorder %v664_v61, 8.507059e+37  ;;  %v2759_v21 = vld [vmem:[#allocation6 + $0x148] sm:$0xff] }
 0x19c   :  { %v1786_v8 = vpop.eup %1785  ;;  %v2771_v61 = vld [vmem:[#allocation6 + $0x128] sm:$0xff] }
 0x19d   :  { %v674_v7 = vadd.f32 1.0, %v1786_v8  ;;  %v2726_v8 = vld [vmem:[#allocation6 + $0x1b0] sm:$0xff] }
 0x19e   :  { %v1788_v12 = vpop.eup %1787 }
 0x19f   :  { %v1790_v14 = vpop.eup %1789  ;;  %v637_v18 = vmul.f32 %v1788_v12, %v635_v22  ;;  %1791 = vrcp.f32 %v674_v7  ;;  %vm642_vm13 = vweird.f32 %v1788_v12  ;;  %v686_v51 = vand.u32 2147483648, %v674_v7  ;;  %v2717_v22 = vld [vmem:[#allocation6 + $0x1d8] sm:$0xff] }
 0x1a0   :  { %v656_v57 = vmul.f32 %v1790_v14, %v654_v48  ;;  %1793 = vtanh.f32 %v630_v35  ;;  %vm661_vm14 = vweird.f32 %v1790_v14  ;;  %vm643_vm1 = vmor %vm641_vm15, %vm642_vm13  ;;  %vm680_vm6 = vweird.f32 %v674_v7  ;;  %v2720_v48 = vld [vmem:[#allocation6 + $0x1a0] sm:$0xff]  ;;  %v2738_v35 = vld [vmem:[#allocation6 + $0x190] sm:$0xff] }
 0x1a1   :  { %v638_v0 = vsub.f32 1.0, %v637_v18  ;;  %vm662_vm2 = vmor %vm660_vm0, %vm661_vm14  ;;  %v684_v52 = vand.u32 2147483647, %v674_v7  ;;  %v687_v54 = vor.u32 1.1754944e-38, %v686_v51  ;;  %v2744_v18 = vld [vmem:[#allocation6 + $0x160] sm:$0xff] }
 0x1a2   :  { %v657_v9 = vsub.f32 1.0, %v656_v57  ;;  %v2747_v57 = vld [vmem:[#allocation6 + $0x168] sm:$0xff]  ;;  %v2824_v51 = vld [vmem:[#allocation6 + $0x80] sm:$0xff] }
 0x1a3   :  { %v639_v17 = vmul.f32 %v1788_v12, %v638_v0  ;;  %vm685_vm8 = vcmp.eq.f32.partialorder %v684_v52, 8.507059e+37  ;;  %v2750_v0 = vld [vmem:[#allocation6 + $0x170] sm:$0xff]  ;;  %3335 = vst [vmem:[#allocation30_spill] sm:$0xff] %v2824_v51  ;;  %v2831_v52 = vld [vmem:[#allocation6 + $0x98] sm:$0xff] }
 0x1a4   :  { %v658_v11 = vmul.f32 %v1790_v14, %v657_v9  ;;  %v2753_v9 = vld [vmem:[#allocation6 + $0x178] sm:$0xff]  ;;  %3337 = vst [vmem:[#allocation18_spill] sm:$0xff] %v2831_v52 }
 0x1a5   :  { %v1792_v6 = vpop.eup %1791  ;;  %v640_v4 = vadd.f32 %v1788_v12, %v639_v17  ;;  %v2762_v17 = vld [vmem:[#allocation6 + $0x150] sm:$0xff] }
 0x1a6   :  { %v659_v16 = vadd.f32 %v1790_v14, %v658_v11  ;;  %v676_v19 = vmul.f32 %v1792_v6, %v674_v7  ;;  %v1794_v27 = vpop.eup %1793  ;;  %vm681_vm5 = vweird.f32 %v1792_v6  ;;  %v2729_v7 = vld [vmem:[#allocation6 + $0x1b8] sm:$0xff]  ;;  %v2768_v11 = vld [vmem:[#allocation6 + $0x120] sm:$0xff] }
 0x1a7   :  { %v644_v25 = vsel %vm643_vm1, %v1788_v12, %v640_v4  ;;  %vm682_vm7 = vmor %vm680_vm6, %vm681_vm5  ;;  %v2732_v12 = vld [vmem:[#allocation6 + $0x180] sm:$0xff]  ;;  %v2777_v4 = vld [vmem:[#allocation6 + $0x138] sm:$0xff] }
 0x1a8   :  { %v649_v28 = vsel %vm646_vm3, %v648_v2, %v644_v25  ;;  %v663_v29 = vsel %vm662_vm2, %v1790_v14, %v659_v16  ;;  %v677_v31 = vsub.f32 1.0, %v676_v19  ;;  %v2741_v14 = vld [vmem:[#allocation6 + $0x198] sm:$0xff]  ;;  %v2780_v2 = vld [vmem:[#allocation6 + $0x100] sm:$0xff]  ;;  %v2783_v16 = vld [vmem:[#allocation6 + $0x108] sm:$0xff] }
 0x1a9   :  { %v668_v32 = vsel %vm665_vm4, %v667_v24, %v663_v29  ;;  %v691_v33 = vmul.f32 %v1794_v27, %v649_v28  ;;  %v2786_v19 = vld [vmem:[#allocation6 + $0x110] sm:$0xff]  ;;  %v2789_v24 = vld [vmem:[#allocation6 + $0x118] sm:$0xff]  ;;  %v2792_v25 = vld [vmem:[#allocation6 + $0xe0] sm:$0xff] }
 0x1aa   :  { %v690_v37 = vmul.f32 %v668_v32, %v2621_v1  ;;  %v678_v41 = vmul.f32 %v1792_v6, %v677_v31  ;;  %v2696_v1 = vld [vmem:[#allocation6 + $0x1e0] sm:$0xff]  ;;  %v2795_v27 = vld [vmem:[#allocation6 + $0xe8] sm:$0xff]  ;;  %v2798_v28 = vld [vmem:[#allocation6 + $0xf0] sm:$0xff] }
 0x1ab   :  { %v2801_v29 = vld [vmem:[#allocation6 + $0xf8] sm:$0xff]  ;;  %v2804_v31 = vld [vmem:[#allocation6 + $0xc0] sm:$0xff]  ;;  %v2807_v32 = vld [vmem:[#allocation6 + $0xc8] sm:$0xff] }
 0x1ac   :  { %v2693_v45 = vadd.f32 %v691_v33, %v690_v37  ;;  %v679_v50 = vadd.f32 %v1792_v6, %v678_v41  ;;  %v2811_v33 = vld [vmem:[#allocation6 + $0xd8] sm:$0xff]  ;;  %v2814_v37 = vld [vmem:[#allocation6 + $0xa0] sm:$0xff]  ;;  %v2817_v41 = vld [vmem:[#allocation6 + $0xa8] sm:$0xff] }
 0x1ad   :  { %3331 = vst [vmem:[#allocation26_spill] sm:$0xff] %v2811_v33 }
 0x1ae   :  { %1795 = vtanh.f32 %v2693_v45  ;;  %v683_v53 = vsel %vm682_vm7, %v1792_v6, %v679_v50  ;;  %v2774_v6 = vld [vmem:[#allocation6 + $0x130] sm:$0xff]  ;;  %3332 = vst [vmem:[#allocation21_spill] sm:$0xff] %v2814_v37  ;;  %v2821_v50 = vld [vmem:[#allocation6 + $0xb8] sm:$0xff] }
 0x1af   :  { %v688_v56 = vsel %vm685_vm8, %v687_v54, %v683_v53  ;;  %3333 = vst [vmem:[#allocation17_spill] sm:$0xff] %v2817_v41  ;;  %v2834_v53 = vld [vmem:[#allocation6 + $0x60] sm:$0xff] }
 0x1b0   :  { %3334 = vst [vmem:[#allocation20_spill] sm:$0xff] %v2821_v50  ;;  %v2842_v54 = vld [vmem:[#allocation6 + $0x40] sm:$0xff] }
 0x1b1   :  { %3338 = vst [vmem:[#allocation23_spill] sm:$0xff] %v2834_v53 }
 0x1b2   :  { %3340 = vst [vmem:[#allocation28_spill] sm:$0xff] %v2842_v54 }
 0x1b4   :  { %v1796_v55 = vpop.eup %1795 }
 0x1b5   :  { %v694_v58 = vmul.f32 %v1796_v55, %v688_v56  ;;  %v3344_v55 = vld [vmem:[#allocation51_spill] sm:$0xff] }
 0x1b7   :  { %715 = vmatmul.f32.vlgmr.msrb.gmra.mxu0 %v694_v58  ;;  %735 = vmatmul.f32.vlgmr.msra.gmra.mxu1 %v694_v58 }
 0x1b8   :  { %755 = vmatmul.f32.vlgmr.msra.gmra.mxu2 %v694_v58  ;;  %775 = vmatmul.f32.vlgmr.msra.gmra.mxu3 %v694_v58  ;;  %v3345_v58 = vld [vmem:[#allocation53_spill] sm:$0xff] }
 0x1b9   :  { %1001 = vmatpush.msrb.mxu0 %v2696_v1  ;;  %1021 = vmatpush.msra.mxu1 %v2699_v59 }
 0x1ba   :  { %1041 = vmatpush.msra.mxu2 %v2702_v60  ;;  %1061 = vmatpush.msra.mxu3 %v2705_v62 }
 0x1bb   :  { %1002 = vmatpush.msrb.mxu0 %v2708_v3  ;;  %1022 = vmatpush.msra.mxu1 %v2711_v10 }
 0x1bc   :  { %1042 = vmatpush.msra.mxu2 %v2714_v5  ;;  %1062 = vmatpush.msra.mxu3 %v2717_v22 }
 0x1bd   :  { %1003 = vmatpush.msrb.mxu0 %v2720_v48  ;;  %1023 = vmatpush.msra.mxu1 %v2723_v13 }
 0x1be   :  { %1043 = vmatpush.msra.mxu2 %v2726_v8  ;;  %1063 = vmatpush.msra.mxu3 %v2729_v7 }
 0x1bf   :  { %1004 = vmatpush.msrb.mxu0 %v2732_v12  ;;  %1024 = vmatpush.msra.mxu1 %v2735_v20 }
 0x1c0   :  { %1044 = vmatpush.msra.mxu2 %v2738_v35  ;;  %1064 = vmatpush.msra.mxu3 %v2741_v14 }
 0x1c1   :  { %1005 = vmatpush.msrb.mxu0 %v2744_v18  ;;  %1025 = vmatpush.msra.mxu1 %v2747_v57 }
 0x1c2   :  { %1045 = vmatpush.msra.mxu2 %v2750_v0  ;;  %1065 = vmatpush.msra.mxu3 %v2753_v9 }
 0x1c3   :  { %1006 = vmatpush.msrb.mxu0 %v2756_v63  ;;  %1026 = vmatpush.msra.mxu1 %v2759_v21 }
 0x1c4   :  { %1046 = vmatpush.msra.mxu2 %v2762_v17  ;;  %1066 = vmatpush.msra.mxu3 %v2765_v23 }
 0x1c5   :  { %1007 = vmatpush.msrb.mxu0 %v2768_v11  ;;  %1027 = vmatpush.msra.mxu1 %v2771_v61 }
 0x1c6   :  { %1047 = vmatpush.msra.mxu2 %v2774_v6  ;;  %1067 = vmatpush.msra.mxu3 %v2777_v4 }
 0x1c7   :  { %1008 = vmatpush.msrb.mxu0 %v2780_v2  ;;  %1028 = vmatpush.msra.mxu1 %v2783_v16 }
 0x1c8   :  { %1048 = vmatpush.msra.mxu2 %v2786_v19  ;;  %1068 = vmatpush.msra.mxu3 %v2789_v24 }
 0x1c9   :  { %1009 = vmatpush.msrb.mxu0 %v2792_v25  ;;  %1029 = vmatpush.msra.mxu1 %v2795_v27 }
 0x1ca   :  { %1049 = vmatpush.msra.mxu2 %v2798_v28  ;;  %1069 = vmatpush.msra.mxu3 %v2801_v29 }
 0x1cb   :  { %1010 = vmatpush.msrb.mxu0 %v2804_v31  ;;  %1030 = vmatpush.msra.mxu1 %v2807_v32 }
 0x1cc   :  { %1050 = vmatpush.msra.mxu2 %v3301_v15  ;;  %1070 = vmatpush.msra.mxu3 %v2811_v33  ;;  %v2827_v15 = vld [vmem:[#allocation6 + $0x88] sm:$0xff] }
 0x1cd   :  { %1011 = vmatpush.msrb.mxu0 %v2814_v37  ;;  %1031 = vmatpush.msra.mxu1 %v2817_v41  ;;  %3336 = vst [vmem:[#allocation24_spill] sm:$0xff] %v2827_v15 }
 0x1ce   :  { %1051 = vmatpush.msra.mxu2 %v3305_v26  ;;  %1071 = vmatpush.msra.mxu3 %v2821_v50  ;;  %v2837_v26 = vld [vmem:[#allocation6 + $0x68] sm:$0xff] }
 0x1cf   :  { %1012 = vmatpush.msrb.mxu0 %v2824_v51  ;;  %1032 = vmatpush.msra.mxu1 %v2827_v15  ;;  %3339 = vst [vmem:[#allocation33_spill] sm:$0xff] %v2837_v26 }
 0x1d0   :  { %1052 = vmatpush.msra.mxu2 %v3309_v30  ;;  %1072 = vmatpush.msra.mxu3 %v2831_v52  ;;  %v2848_v30 = vld [vmem:[#allocation6 + $0x20] sm:$0xff] }
 0x1d1   :  { %1013 = vmatpush.msrb.mxu0 %v2834_v53  ;;  %1033 = vmatpush.msra.mxu1 %v2837_v26  ;;  %3341 = vst [vmem:[#allocation19_spill] sm:$0xff] %v2848_v30 }
 0x1d2   :  { %1053 = vmatpush.msra.mxu2 %v3313_v34  ;;  %1073 = vmatpush.msra.mxu3 %v3314_v36  ;;  %v2854_v34 = vld [vmem:[#allocation6] sm:$0xff] }
 0x1d3   :  { %1014 = vmatpush.msrb.mxu0 %v2842_v54  ;;  %1034 = vmatpush.msra.mxu1 %v3316_v38  ;;  %3342 = vst [vmem:[#allocation27_spill] sm:$0xff] %v2854_v34 }
 0x1d4   :  { %1054 = vmatpush.msra.mxu2 %v3317_v39  ;;  %1074 = vmatpush.msra.mxu3 %v3318_v40  ;;  %v3343_v39 = vld [vmem:[#allocation46_spill] sm:$0xff] }
 0x1d5   :  { %1015 = vmatpush.msrb.mxu0 %v2848_v30  ;;  %1035 = vmatpush.msra.mxu1 %v3320_v42 }
 0x1d6   :  { %1055 = vmatpush.msra.mxu2 %v3321_v43  ;;  %1075 = vmatpush.msra.mxu3 %v3322_v44 }
 0x1d7   :  { %1016 = vmatpush.msrb.mxu0 %v2854_v34  ;;  %1036 = vmatpush.msra.mxu1 %v3324_v46 }
 0x1d8   :  { %1056 = vmatpush.msra.mxu2 %v3325_v47  ;;  %1076 = vmatpush.msra.mxu3 %v3326_v49 }
 0x234   :  { %v716_v36 = vpop.f32.mrf.mxu0  ;;  %v736_v38 = vpop.f32.mrf.mxu1 }
 0x235   :  { %v779_v40 = vadd.f32 %v716_v36, %v3343_v39  ;;  %v780_v42 = vadd.f32 %v736_v38, %v3344_v55  ;;  %v3346_v38 = vld [vmem:[#allocation52_spill] sm:$0xff] }
 0x237   :  { %v1724_v56 = vmul.f32 -1.442695, %v779_v40  ;;  %v1725_v43 = vmul.f32 -1.442695, %v780_v42 }
 0x239   :  { %1797 = vpow2.f32 %v1724_v56 }
 0x23a   :  { %1799 = vpow2.f32 %v1725_v43 }
 0x23b   :  { %v776_v44 = vpop.f32.mrf.mxu3  ;;  %v756_v49 = vpop.f32.mrf.mxu2 }
 0x23c   :  { %v782_v30 = vadd.f32 %v776_v44, %v3345_v58  ;;  %v781_v40 = vadd.f32 %v756_v49, %v3346_v38 }
 0x23e   :  { %v1726_v34 = vmul.f32 -1.442695, %v782_v30 }
 0x23f   :  { %v1798_v54 = vpop.eup %1797 }
 0x240   :  { %v1800_v46 = vpop.eup %1799  ;;  %v786_v26 = vadd.f32 1.0, %v1798_v54  ;;  %1801 = vpow2.f32 %v1726_v34 }
 0x241   :  { %v805_v47 = vadd.f32 1.0, %v1800_v46 }
 0x242   :  { %1803 = vrcp.f32 %v786_v26  ;;  %v798_v30 = vand.u32 2147483648, %v786_v26  ;;  %v796_v34 = vand.u32 2147483647, %v786_v26  ;;  %vm792_vm11 = vweird.f32 %v786_v26 }
 0x243   :  { %1805 = vrcp.f32 %v805_v47  ;;  %v817_v58 = vand.u32 2147483648, %v805_v47  ;;  %v815_v52 = vand.u32 2147483647, %v805_v47  ;;  %vm811_vm12 = vweird.f32 %v805_v47 }
 0x244   :  { %v799_v49 = vor.u32 1.1754944e-38, %v798_v30  ;;  %vm797_vm15 = vcmp.eq.f32.partialorder %v796_v34, 8.507059e+37 }
 0x245   :  { %vm816_vm0 = vcmp.eq.f32.partialorder %v815_v52, 8.507059e+37 }
 0x246   :  { %v1802_v53 = vpop.eup %1801 }
 0x247   :  { %v825_v36 = vadd.f32 1.0, %v1802_v53 }
 0x248   :  { %v1804_v39 = vpop.eup %1803 }
 0x249   :  { %v1806_v55 = vpop.eup %1805  ;;  %v788_v42 = vmul.f32 %v1804_v39, %v786_v26  ;;  %1807 = vrcp.f32 %v825_v36  ;;  %vm793_vm9 = vweird.f32 %v1804_v39  ;;  %v837_v30 = vand.u32 2147483648, %v825_v36 }
 0x24a   :  { %v807_v56 = vmul.f32 %v1806_v55, %v805_v47  ;;  %1809 = vtanh.f32 %v781_v40  ;;  %vm812_vm10 = vweird.f32 %v1806_v55  ;;  %vm794_vm13 = vmor %vm792_vm11, %vm793_vm9  ;;  %vm831_vm2 = vweird.f32 %v825_v36 }
 0x24b   :  { %v789_v43 = vsub.f32 1.0, %v788_v42  ;;  %vm813_vm14 = vmor %vm811_vm12, %vm812_vm10  ;;  %v818_v42 = vor.u32 1.1754944e-38, %v817_v58  ;;  %v838_v34 = vor.u32 1.1754944e-38, %v837_v30  ;;  %v3365_v30 = vld [vmem:[#allocation19_spill] sm:$0xff] }
 0x24c   :  { %v808_v44 = vsub.f32 1.0, %v807_v56 }
 0x24d   :  { %v790_v54 = vmul.f32 %v1804_v39, %v789_v43 }
 0x24e   :  { %v809_v46 = vmul.f32 %v1806_v55, %v808_v44 }
 0x24f   :  { %v1808_v15 = vpop.eup %1807  ;;  %v791_v53 = vadd.f32 %v1804_v39, %v790_v54 }
 0x250   :  { %v810_v38 = vadd.f32 %v1806_v55, %v809_v46  ;;  %v827_v51 = vmul.f32 %v1808_v15, %v825_v36  ;;  %v1810_v40 = vpop.eup %1809  ;;  %vm832_vm1 = vweird.f32 %v1808_v15  ;;  %v3354_v46 = vld [vmem:[#allocation24_spill] sm:$0xff] }
 0x251   :  { %v795_v56 = vsel %vm794_vm13, %v1804_v39, %v791_v53  ;;  %v835_v39 = vand.u32 2147483647, %v825_v36  ;;  %vm833_vm3 = vmor %vm831_vm2, %vm832_vm1  ;;  %v3353_v36 = vld [vmem:[#allocation30_spill] sm:$0xff]  ;;  %v2918_v53 = vld [vmem:[#allocation6 + $0x90] sm:$0xff] }
 0x252   :  { %v800_v50 = vsel %vm797_vm15, %v799_v49, %v795_v56  ;;  %v814_v43 = vsel %vm813_vm14, %v1806_v55, %v810_v38  ;;  %v828_v41 = vsub.f32 1.0, %v827_v51  ;;  %3355 = vst [vmem:[#allocation22_spill] sm:$0xff] %v2918_v53  ;;  %v3356_v49 = vld [vmem:[#allocation18_spill] sm:$0xff]  ;;  %v3357_v38 = vld [vmem:[#allocation23_spill] sm:$0xff]  ;;  %v2924_v56 = vld [vmem:[#allocation6 + $0x70] sm:$0xff] }
 0x253   :  { %v819_v44 = vsel %vm816_vm0, %v818_v42, %v814_v43  ;;  %v842_v37 = vmul.f32 %v1810_v40, %v800_v50  ;;  %vm836_vm4 = vcmp.eq.f32.partialorder %v835_v39, 8.507059e+37  ;;  %v2912_v50 = vld [vmem:[#allocation6 + $0xb0] sm:$0xff]  ;;  %v3358_v42 = vld [vmem:[#allocation33_spill] sm:$0xff]  ;;  %3359 = vst [vmem:[#allocation31_spill] sm:$0xff] %v2924_v56  ;;  %v2941_v39 = vld [vmem:[#allocation6 + $0x28] sm:$0xff] }
 0x254   :  { %v841_v33 = vmul.f32 %v819_v44, %v2693_v45  ;;  %v829_v54 = vmul.f32 %v1808_v15, %v828_v41  ;;  %v2906_v45 = vld [vmem:[#allocation6 + $0xd0] sm:$0xff]  ;;  %v3350_v41 = vld [vmem:[#allocation17_spill] sm:$0xff]  ;;  %3351 = vst [vmem:[#allocation32_spill] sm:$0xff] %v2912_v50  ;;  %v2931_v44 = vld [vmem:[#allocation6 + $0x48] sm:$0xff] }
 0x255   :  { %3347 = vst [vmem:[#allocation36_spill] sm:$0xff] %v2906_v45  ;;  %v2927_v40 = vld [vmem:[#allocation6 + $0x78] sm:$0xff]  ;;  %v3361_v43 = vld [vmem:[#allocation28_spill] sm:$0xff] }
 0x256   :  { %v2865_v26 = vadd.f32 %v842_v37, %v841_v33  ;;  %v830_v47 = vadd.f32 %v1808_v15, %v829_v54  ;;  %v3348_v33 = vld [vmem:[#allocation26_spill] sm:$0xff]  ;;  %v3349_v37 = vld [vmem:[#allocation21_spill] sm:$0xff]  ;;  %3360 = vst [vmem:[#allocation39_spill] sm:$0xff] %v2927_v40  ;;  %v2934_v54 = vld [vmem:[#allocation6 + $0x50] sm:$0xff] }
 0x257   :  { %3362 = vst [vmem:[#allocation35_spill] sm:$0xff] %v2931_v44 }
 0x258   :  { %1811 = vtanh.f32 %v2865_v26  ;;  %v834_v58 = vsel %vm833_vm3, %v1808_v15, %v830_v47  ;;  %v3352_v15 = vld [vmem:[#allocation20_spill] sm:$0xff]  ;;  %3363 = vst [vmem:[#allocation25_spill] sm:$0xff] %v2934_v54  ;;  %v2937_v47 = vld [vmem:[#allocation6 + $0x58] sm:$0xff] }
 0x259   :  { %v839_v51 = vsel %vm836_vm4, %v838_v34, %v834_v58  ;;  %3364 = vst [vmem:[#allocation34_spill] sm:$0xff] %v2937_v47  ;;  %v2944_v58 = vld [vmem:[#allocation6 + $0x30] sm:$0xff]  ;;  %v2947_v34 = vld [vmem:[#allocation6 + $0x38] sm:$0xff] }
 0x25a   :  { %3366 = vst [vmem:[#allocation40_spill] sm:$0xff] %v2941_v39 }
 0x25b   :  { %3367 = vst [vmem:[#allocation38_spill] sm:$0xff] %v2944_v58 }
 0x25c   :  { %3368 = vst [vmem:[#allocation29_spill] sm:$0xff] %v2947_v34 }
 0x25e   :  { %v1812_v52 = vpop.eup %1811 }
 0x25f   :  { %v845_v55 = vmul.f32 %v1812_v52, %v839_v51  ;;  %v3369_v52 = vld [vmem:[#allocation27_spill] sm:$0xff] }
 0x260   :  { %v2951_v51 = vld [vmem:[#allocation6 + $0x8] sm:$0xff] }
 0x261   :  { %866 = vmatmul.f32.vlgmr.msra.gmra.mxu0 %v845_v55  ;;  %886 = vmatmul.f32.vlgmr.msrb.gmra.mxu1 %v845_v55  ;;  %3370 = vst [vmem:[#allocation37_spill] sm:$0xff] %v2951_v51 }
 0x262   :  { %906 = vmatmul.f32.vlgmr.msrb.gmra.mxu2 %v845_v55  ;;  %926 = vmatmul.f32.vlgmr.msrb.gmra.mxu3 %v845_v55  ;;  %v2954_v55 = vld [vmem:[#allocation6 + $0x10] sm:$0xff] }
 0x263   :  { %1152 = vmatpush.msra.mxu0 %v2696_v1  ;;  %1172 = vmatpush.msrb.mxu1 %v2699_v59  ;;  %3371 = vst [vmem:[#allocation42_spill] sm:$0xff] %v2954_v55 }
 0x264   :  { %1192 = vmatpush.msrb.mxu2 %v2702_v60  ;;  %1212 = vmatpush.msrb.mxu3 %v2705_v62 }
 0x265   :  { %1153 = vmatpush.msra.mxu0 %v2708_v3  ;;  %1173 = vmatpush.msrb.mxu1 %v2711_v10 }
 0x266   :  { %1193 = vmatpush.msrb.mxu2 %v2714_v5  ;;  %1213 = vmatpush.msrb.mxu3 %v2717_v22 }
 0x267   :  { %1154 = vmatpush.msra.mxu0 %v2720_v48  ;;  %1174 = vmatpush.msrb.mxu1 %v2723_v13 }
 0x268   :  { %1194 = vmatpush.msrb.mxu2 %v2726_v8  ;;  %1214 = vmatpush.msrb.mxu3 %v2729_v7 }
 0x269   :  { %1155 = vmatpush.msra.mxu0 %v2732_v12  ;;  %1175 = vmatpush.msrb.mxu1 %v2735_v20 }
 0x26a   :  { %1195 = vmatpush.msrb.mxu2 %v2738_v35  ;;  %1215 = vmatpush.msrb.mxu3 %v2741_v14 }
 0x26b   :  { %1156 = vmatpush.msra.mxu0 %v2744_v18  ;;  %1176 = vmatpush.msrb.mxu1 %v2747_v57 }
 0x26c   :  { %1196 = vmatpush.msrb.mxu2 %v2750_v0  ;;  %1216 = vmatpush.msrb.mxu3 %v2753_v9 }
 0x26d   :  { %1157 = vmatpush.msra.mxu0 %v2756_v63  ;;  %1177 = vmatpush.msrb.mxu1 %v2759_v21 }
 0x26e   :  { %1197 = vmatpush.msrb.mxu2 %v2762_v17  ;;  %1217 = vmatpush.msrb.mxu3 %v2765_v23 }
 0x26f   :  { %1158 = vmatpush.msra.mxu0 %v2768_v11  ;;  %1178 = vmatpush.msrb.mxu1 %v2771_v61 }
 0x270   :  { %1198 = vmatpush.msrb.mxu2 %v2774_v6  ;;  %1218 = vmatpush.msrb.mxu3 %v2777_v4 }
 0x271   :  { %1159 = vmatpush.msra.mxu0 %v2780_v2  ;;  %1179 = vmatpush.msrb.mxu1 %v2783_v16 }
 0x272   :  { %1199 = vmatpush.msrb.mxu2 %v2786_v19  ;;  %1219 = vmatpush.msrb.mxu3 %v2789_v24 }
 0x273   :  { %1160 = vmatpush.msra.mxu0 %v2792_v25  ;;  %1180 = vmatpush.msrb.mxu1 %v2795_v27 }
 0x274   :  { %1200 = vmatpush.msrb.mxu2 %v2798_v28  ;;  %1220 = vmatpush.msrb.mxu3 %v2801_v29 }
 0x275   :  { %1161 = vmatpush.msra.mxu0 %v2804_v31  ;;  %1181 = vmatpush.msrb.mxu1 %v2807_v32 }
 0x276   :  { %1201 = vmatpush.msrb.mxu2 %v2906_v45  ;;  %1221 = vmatpush.msrb.mxu3 %v3348_v33 }
 0x277   :  { %1162 = vmatpush.msra.mxu0 %v3349_v37  ;;  %1182 = vmatpush.msrb.mxu1 %v3350_v41 }
 0x278   :  { %1202 = vmatpush.msrb.mxu2 %v2912_v50  ;;  %1222 = vmatpush.msrb.mxu3 %v3352_v15 }
 0x279   :  { %1163 = vmatpush.msra.mxu0 %v3353_v36  ;;  %1183 = vmatpush.msrb.mxu1 %v3354_v46 }
 0x27a   :  { %1203 = vmatpush.msrb.mxu2 %v2918_v53  ;;  %1223 = vmatpush.msrb.mxu3 %v3356_v49 }
 0x27b   :  { %1164 = vmatpush.msra.mxu0 %v3357_v38  ;;  %1184 = vmatpush.msrb.mxu1 %v3358_v42 }
 0x27c   :  { %1204 = vmatpush.msrb.mxu2 %v2924_v56  ;;  %1224 = vmatpush.msrb.mxu3 %v2927_v40 }
 0x27d   :  { %1165 = vmatpush.msra.mxu0 %v3361_v43  ;;  %1185 = vmatpush.msrb.mxu1 %v2931_v44  ;;  %v3374_v44 = vld [vmem:[#allocation55_spill] sm:$0xff] }
 0x27e   :  { %1205 = vmatpush.msrb.mxu2 %v2934_v54  ;;  %1225 = vmatpush.msrb.mxu3 %v2937_v47  ;;  %v3373_v47 = vld [vmem:[#allocation50_spill] sm:$0xff] }
 0x27f   :  { %1166 = vmatpush.msra.mxu0 %v3365_v30  ;;  %1186 = vmatpush.msrb.mxu1 %v2941_v39  ;;  %v2957_v30 = vld [vmem:[#allocation6 + $0x18] sm:$0xff] }
 0x280   :  { %1206 = vmatpush.msrb.mxu2 %v2944_v58  ;;  %1226 = vmatpush.msrb.mxu3 %v2947_v34  ;;  %3372 = vst [vmem:[#allocation41_spill] sm:$0xff] %v2957_v30 }
 0x281   :  { %1167 = vmatpush.msra.mxu0 %v3369_v52  ;;  %1187 = vmatpush.msrb.mxu1 %v2951_v51  ;;  %v3375_v51 = vld [vmem:[#allocation57_spill] sm:$0xff] }
 0x282   :  { %1207 = vmatpush.msrb.mxu2 %v2954_v55  ;;  %1227 = vmatpush.msrb.mxu3 %v2957_v30 }
 0x2de   :  { %v867_v39 = vpop.f32.mrf.mxu0  ;;  %v887_v58 = vpop.f32.mrf.mxu1 }
 0x2df   :  { %v930_v54 = vadd.f32 %v867_v39, %v3373_v47  ;;  %v931_v34 = vadd.f32 %v887_v58, %v3374_v44  ;;  %v3376_v44 = vld [vmem:[#allocation56_spill] sm:$0xff] }
 0x2e1   :  { %v1727_v43 = vmul.f32 -1.442695, %v930_v54  ;;  %v1728_v52 = vmul.f32 -1.442695, %v931_v34 }
 0x2e3   :  { %1813 = vpow2.f32 %v1727_v43 }
 0x2e4   :  { %1815 = vpow2.f32 %v1728_v52 }
 0x2e5   :  { %v927_v40 = vpop.f32.mrf.mxu3  ;;  %v907_v30 = vpop.f32.mrf.mxu2 }
 0x2e6   :  { %v933_v56 = vadd.f32 %v927_v40, %v3375_v51  ;;  %v932_v54 = vadd.f32 %v907_v30, %v3376_v44 }
 0x2e8   :  { %v1729_v42 = vmul.f32 -1.442695, %v933_v56 }
 0x2e9   :  { %v1814_v38 = vpop.eup %1813 }
 0x2ea   :  { %v1816_v55 = vpop.eup %1815  ;;  %v937_v49 = vadd.f32 1.0, %v1814_v38  ;;  %1817 = vpow2.f32 %v1729_v42 }
 0x2eb   :  { %v956_v53 = vadd.f32 1.0, %v1816_v55 }
 0x2ec   :  { %1819 = vrcp.f32 %v937_v49  ;;  %v949_v56 = vand.u32 2147483648, %v937_v49  ;;  %v947_v42 = vand.u32 2147483647, %v937_v49  ;;  %vm943_vm7 = vweird.f32 %v937_v49 }
 0x2ed   :  { %1821 = vrcp.f32 %v956_v53  ;;  %v968_v51 = vand.u32 2147483648, %v956_v53  ;;  %v966_v36 = vand.u32 2147483647, %v956_v53  ;;  %vm962_vm8 = vweird.f32 %v956_v53 }
 0x2ee   :  { %v950_v30 = vor.u32 1.1754944e-38, %v949_v56  ;;  %vm948_vm11 = vcmp.eq.f32.partialorder %v947_v42, 8.507059e+37 }
 0x2ef   :  { %vm967_vm12 = vcmp.eq.f32.partialorder %v966_v36, 8.507059e+37 }
 0x2f0   :  { %v1818_v46 = vpop.eup %1817 }
 0x2f1   :  { %v976_v47 = vadd.f32 1.0, %v1818_v46 }
 0x2f2   :  { %v1820_v39 = vpop.eup %1819 }
 0x2f3   :  { %v1822_v58 = vpop.eup %1821  ;;  %v939_v43 = vmul.f32 %v1820_v39, %v937_v49  ;;  %1823 = vrcp.f32 %v976_v47  ;;  %vm944_vm5 = vweird.f32 %v1820_v39  ;;  %v988_v56 = vand.u32 2147483648, %v976_v47 }
 0x2f4   :  { %v958_v34 = vmul.f32 %v1822_v58, %v956_v53  ;;  %1825 = vtanh.f32 %v932_v54  ;;  %vm963_vm6 = vweird.f32 %v1822_v58  ;;  %vm945_vm9 = vmor %vm943_vm7, %vm944_vm5  ;;  %vm982_vm14 = vweird.f32 %v976_v47 }
 0x2f5   :  { %v940_v52 = vsub.f32 1.0, %v939_v43  ;;  %vm964_vm10 = vmor %vm962_vm8, %vm963_vm6  ;;  %v969_v43 = vor.u32 1.1754944e-38, %v968_v51  ;;  %v989_v42 = vor.u32 1.1754944e-38, %v988_v56  ;;  %v3395_v56 = vld [vmem:[#allocation19_spill] sm:$0xff] }
 0x2f6   :  { %v959_v40 = vsub.f32 1.0, %v958_v34 }
 0x2f7   :  { %v941_v38 = vmul.f32 %v1820_v39, %v940_v52 }
 0x2f8   :  { %v960_v55 = vmul.f32 %v1822_v58, %v959_v40 }
 0x2f9   :  { %v1824_v15 = vpop.eup %1823  ;;  %v942_v46 = vadd.f32 %v1820_v39, %v941_v38 }
 0x2fa   :  { %v961_v44 = vadd.f32 %v1822_v58, %v960_v55  ;;  %v978_v50 = vmul.f32 %v1824_v15, %v976_v47  ;;  %v1826_v54 = vpop.eup %1825  ;;  %vm983_vm13 = vweird.f32 %v1824_v15  ;;  %v3384_v55 = vld [vmem:[#allocation24_spill] sm:$0xff] }
 0x2fb   :  { %v946_v34 = vsel %vm945_vm9, %v1820_v39, %v942_v46  ;;  %v986_v39 = vand.u32 2147483647, %v976_v47  ;;  %vm984_vm15 = vmor %vm982_vm14, %vm983_vm13  ;;  %v3383_v47 = vld [vmem:[#allocation30_spill] sm:$0xff] }
 0x2fc   :  { %v951_v41 = vsel %vm948_vm11, %v950_v30, %v946_v34  ;;  %v965_v52 = vsel %vm964_vm10, %v1822_v58, %v961_v44  ;;  %v979_v37 = vsub.f32 1.0, %v978_v50  ;;  %v3385_v46 = vld [vmem:[#allocation22_spill] sm:$0xff]  ;;  %v3387_v44 = vld [vmem:[#allocation23_spill] sm:$0xff] }
 0x2fd   :  { %v970_v40 = vsel %vm967_vm12, %v969_v43, %v965_v52  ;;  %v993_v33 = vmul.f32 %v1826_v54, %v951_v41  ;;  %vm987_vm0 = vcmp.eq.f32.partialorder %v986_v39, 8.507059e+37  ;;  %v3381_v41 = vld [vmem:[#allocation32_spill] sm:$0xff]  ;;  %v3386_v30 = vld [vmem:[#allocation18_spill] sm:$0xff]  ;;  %v3388_v43 = vld [vmem:[#allocation33_spill] sm:$0xff] }
 0x2fe   :  { %v992_v45 = vmul.f32 %v970_v40, %v2865_v26  ;;  %v980_v38 = vmul.f32 %v1824_v15, %v979_v37  ;;  %v3377_v26 = vld [vmem:[#allocation36_spill] sm:$0xff]  ;;  %v3380_v37 = vld [vmem:[#allocation17_spill] sm:$0xff]  ;;  %v3389_v34 = vld [vmem:[#allocation31_spill] sm:$0xff] }
 0x2ff   :  { %v3390_v54 = vld [vmem:[#allocation39_spill] sm:$0xff]  ;;  %v3391_v52 = vld [vmem:[#allocation28_spill] sm:$0xff] }
 0x300   :  { %v2965_v49 = vadd.f32 %v993_v33, %v992_v45  ;;  %v981_v53 = vadd.f32 %v1824_v15, %v980_v38  ;;  %v3378_v45 = vld [vmem:[#allocation26_spill] sm:$0xff]  ;;  %v3379_v33 = vld [vmem:[#allocation21_spill] sm:$0xff]  ;;  %v3392_v40 = vld [vmem:[#allocation35_spill] sm:$0xff] }
 0x301   :  { %v3393_v38 = vld [vmem:[#allocation25_spill] sm:$0xff]  ;;  %v3396_v39 = vld [vmem:[#allocation40_spill] sm:$0xff] }
 0x302   :  { %1827 = vtanh.f32 %v2965_v49  ;;  %v985_v51 = vsel %vm984_vm15, %v1824_v15, %v981_v53  ;;  %v3382_v15 = vld [vmem:[#allocation20_spill] sm:$0xff]  ;;  %v3394_v53 = vld [vmem:[#allocation34_spill] sm:$0xff] }
 0x303   :  { %v990_v50 = vsel %vm987_vm0, %v989_v42, %v985_v51  ;;  %v3397_v51 = vld [vmem:[#allocation38_spill] sm:$0xff]  ;;  %v3398_v42 = vld [vmem:[#allocation29_spill] sm:$0xff] }
 0x308   :  { %v1828_v36 = vpop.eup %1827 }
 0x309   :  { %v996_v58 = vmul.f32 %v1828_v36, %v990_v50  ;;  %v3399_v36 = vld [vmem:[#allocation27_spill] sm:$0xff]  ;;  %v3400_v50 = vld [vmem:[#allocation37_spill] sm:$0xff] }
 0x30b   :  { %1017 = vmatmul.f32.vlgmr.msrb.gmra.mxu0 %v996_v58  ;;  %1037 = vmatmul.f32.vlgmr.msra.gmra.mxu1 %v996_v58 }
 0x30c   :  { %1057 = vmatmul.f32.vlgmr.msra.gmra.mxu2 %v996_v58  ;;  %1077 = vmatmul.f32.vlgmr.msra.gmra.mxu3 %v996_v58  ;;  %v3401_v58 = vld [vmem:[#allocation42_spill] sm:$0xff] }
 0x30d   :  { %1303 = vmatpush.msrb.mxu0 %v2696_v1  ;;  %1323 = vmatpush.msra.mxu1 %v2699_v59 }
 0x30e   :  { %1343 = vmatpush.msra.mxu2 %v2702_v60  ;;  %1363 = vmatpush.msra.mxu3 %v2705_v62 }
 0x30f   :  { %1304 = vmatpush.msrb.mxu0 %v2708_v3  ;;  %1324 = vmatpush.msra.mxu1 %v2711_v10 }
 0x310   :  { %1344 = vmatpush.msra.mxu2 %v2714_v5  ;;  %1364 = vmatpush.msra.mxu3 %v2717_v22 }
 0x311   :  { %1305 = vmatpush.msrb.mxu0 %v2720_v48  ;;  %1325 = vmatpush.msra.mxu1 %v2723_v13 }
 0x312   :  { %1345 = vmatpush.msra.mxu2 %v2726_v8  ;;  %1365 = vmatpush.msra.mxu3 %v2729_v7 }
 0x313   :  { %1306 = vmatpush.msrb.mxu0 %v2732_v12  ;;  %1326 = vmatpush.msra.mxu1 %v2735_v20 }
 0x314   :  { %1346 = vmatpush.msra.mxu2 %v2738_v35  ;;  %1366 = vmatpush.msra.mxu3 %v2741_v14 }
 0x315   :  { %1307 = vmatpush.msrb.mxu0 %v2744_v18  ;;  %1327 = vmatpush.msra.mxu1 %v2747_v57 }
 0x316   :  { %1347 = vmatpush.msra.mxu2 %v2750_v0  ;;  %1367 = vmatpush.msra.mxu3 %v2753_v9 }
 0x317   :  { %1308 = vmatpush.msrb.mxu0 %v2756_v63  ;;  %1328 = vmatpush.msra.mxu1 %v2759_v21 }
 0x318   :  { %1348 = vmatpush.msra.mxu2 %v2762_v17  ;;  %1368 = vmatpush.msra.mxu3 %v2765_v23 }
 0x319   :  { %1309 = vmatpush.msrb.mxu0 %v2768_v11  ;;  %1329 = vmatpush.msra.mxu1 %v2771_v61 }
 0x31a   :  { %1349 = vmatpush.msra.mxu2 %v2774_v6  ;;  %1369 = vmatpush.msra.mxu3 %v2777_v4 }
 0x31b   :  { %1310 = vmatpush.msrb.mxu0 %v2780_v2  ;;  %1330 = vmatpush.msra.mxu1 %v2783_v16 }
 0x31c   :  { %1350 = vmatpush.msra.mxu2 %v2786_v19  ;;  %1370 = vmatpush.msra.mxu3 %v2789_v24 }
 0x31d   :  { %1311 = vmatpush.msrb.mxu0 %v2792_v25  ;;  %1331 = vmatpush.msra.mxu1 %v2795_v27 }
 0x31e   :  { %1351 = vmatpush.msra.mxu2 %v2798_v28  ;;  %1371 = vmatpush.msra.mxu3 %v2801_v29 }
 0x31f   :  { %1312 = vmatpush.msrb.mxu0 %v2804_v31  ;;  %1332 = vmatpush.msra.mxu1 %v2807_v32 }
 0x320   :  { %1352 = vmatpush.msra.mxu2 %v3377_v26  ;;  %1372 = vmatpush.msra.mxu3 %v3378_v45 }
 0x321   :  { %1313 = vmatpush.msrb.mxu0 %v3379_v33  ;;  %1333 = vmatpush.msra.mxu1 %v3380_v37 }
 0x322   :  { %1353 = vmatpush.msra.mxu2 %v3381_v41  ;;  %1373 = vmatpush.msra.mxu3 %v3382_v15 }
 0x323   :  { %1314 = vmatpush.msrb.mxu0 %v3383_v47  ;;  %1334 = vmatpush.msra.mxu1 %v3384_v55 }
 0x324   :  { %1354 = vmatpush.msra.mxu2 %v3385_v46  ;;  %1374 = vmatpush.msra.mxu3 %v3386_v30 }
 0x325   :  { %1315 = vmatpush.msrb.mxu0 %v3387_v44  ;;  %1335 = vmatpush.msra.mxu1 %v3388_v43 }
 0x326   :  { %1355 = vmatpush.msra.mxu2 %v3389_v34  ;;  %1375 = vmatpush.msra.mxu3 %v3390_v54  ;;  %v3403_v54 = vld [vmem:[#allocation54_spill] sm:$0xff] }
 0x327   :  { %1316 = vmatpush.msrb.mxu0 %v3391_v52  ;;  %1336 = vmatpush.msra.mxu1 %v3392_v40  ;;  %v3402_v52 = vld [vmem:[#allocation41_spill] sm:$0xff]  ;;  %v3404_v34 = vld [vmem:[#allocation58_spill] sm:$0xff] }
 0x328   :  { %1356 = vmatpush.msra.mxu2 %v3393_v38  ;;  %1376 = vmatpush.msra.mxu3 %v3394_v53 }
 0x329   :  { %1317 = vmatpush.msrb.mxu0 %v3395_v56  ;;  %1337 = vmatpush.msra.mxu1 %v3396_v39 }
 0x32a   :  { %1357 = vmatpush.msra.mxu2 %v3397_v51  ;;  %1377 = vmatpush.msra.mxu3 %v3398_v42  ;;  %v3405_v42 = vld [vmem:[#allocation60_spill] sm:$0xff] }
 0x32b   :  { %1318 = vmatpush.msrb.mxu0 %v3399_v36  ;;  %1338 = vmatpush.msra.mxu1 %v3400_v50 }
 0x32c   :  { %1358 = vmatpush.msra.mxu2 %v3401_v58  ;;  %1378 = vmatpush.msra.mxu3 %v3402_v52 }
 0x388   :  { %v1018_v40 = vpop.f32.mrf.mxu0  ;;  %v1038_v38 = vpop.f32.mrf.mxu1 }
 0x389   :  { %v1081_v53 = vadd.f32 %v1018_v40, %v3403_v54  ;;  %v1082_v56 = vadd.f32 %v1038_v38, %v3404_v34  ;;  %v3406_v34 = vld [vmem:[#allocation59_spill] sm:$0xff] }
 0x38b   :  { %v1730_v43 = vmul.f32 -1.442695, %v1081_v53  ;;  %v1731_v39 = vmul.f32 -1.442695, %v1082_v56 }
 0x38d   :  { %1829 = vpow2.f32 %v1730_v43 }
 0x38e   :  { %1831 = vpow2.f32 %v1731_v39 }
 0x38f   :  { %v1078_v51 = vpop.f32.mrf.mxu3  ;;  %v1058_v52 = vpop.f32.mrf.mxu2 }
 0x390   :  { %v1084_v44 = vadd.f32 %v1078_v51, %v3405_v42  ;;  %v1083_v38 = vadd.f32 %v1058_v52, %v3406_v34 }
 0x392   :  { %v1732_v36 = vmul.f32 -1.442695, %v1084_v44 }
 0x393   :  { %v1830_v30 = vpop.eup %1829 }
 0x394   :  { %v1832_v50 = vpop.eup %1831  ;;  %v1088_v46 = vadd.f32 1.0, %v1830_v30  ;;  %1833 = vpow2.f32 %v1732_v36 }
 0x395   :  { %v1107_v58 = vadd.f32 1.0, %v1832_v50 }
 0x396   :  { %1835 = vrcp.f32 %v1088_v46  ;;  %v1100_v44 = vand.u32 2147483648, %v1088_v46  ;;  %v1098_v36 = vand.u32 2147483647, %v1088_v46  ;;  %vm1094_vm3 = vweird.f32 %v1088_v46 }
 0x397   :  { %1837 = vrcp.f32 %v1107_v58  ;;  %v1119_v42 = vand.u32 2147483648, %v1107_v58  ;;  %v1117_v47 = vand.u32 2147483647, %v1107_v58  ;;  %vm1113_vm4 = vweird.f32 %v1107_v58 }
 0x398   :  { %v1101_v52 = vor.u32 1.1754944e-38, %v1100_v44  ;;  %vm1099_vm7 = vcmp.eq.f32.partialorder %v1098_v36, 8.507059e+37 }
 0x399   :  { %vm1118_vm8 = vcmp.eq.f32.partialorder %v1117_v47, 8.507059e+37 }
 0x39a   :  { %v1834_v55 = vpop.eup %1833 }
 0x39b   :  { %v1127_v54 = vadd.f32 1.0, %v1834_v55 }
 0x39c   :  { %v1836_v40 = vpop.eup %1835 }
 0x39d   :  { %v1838_v53 = vpop.eup %1837  ;;  %v1090_v43 = vmul.f32 %v1836_v40, %v1088_v46  ;;  %1839 = vrcp.f32 %v1127_v54  ;;  %vm1095_vm1 = vweird.f32 %v1836_v40  ;;  %v1139_v44 = vand.u32 2147483648, %v1127_v54 }
 0x39e   :  { %v1109_v56 = vmul.f32 %v1838_v53, %v1107_v58  ;;  %1841 = vtanh.f32 %v1083_v38  ;;  %vm1114_vm2 = vweird.f32 %v1838_v53  ;;  %vm1096_vm5 = vmor %vm1094_vm3, %vm1095_vm1  ;;  %vm1133_vm10 = vweird.f32 %v1127_v54 }
 0x39f   :  { %v1091_v39 = vsub.f32 1.0, %v1090_v43  ;;  %vm1115_vm6 = vmor %vm1113_vm4, %vm1114_vm2  ;;  %v1120_v43 = vor.u32 1.1754944e-38, %v1119_v42  ;;  %v1140_v36 = vor.u32 1.1754944e-38, %v1139_v44 }
 0x3a0   :  { %v1110_v51 = vsub.f32 1.0, %v1109_v56 }
 0x3a1   :  { %v1092_v30 = vmul.f32 %v1836_v40, %v1091_v39 }
 0x3a2   :  { %v1111_v50 = vmul.f32 %v1838_v53, %v1110_v51 }
 0x3a3   :  { %v1840_v15 = vpop.eup %1839  ;;  %v1093_v55 = vadd.f32 %v1836_v40, %v1092_v30 }
 0x3a4   :  { %v1112_v34 = vadd.f32 %v1838_v53, %v1111_v50  ;;  %v1129_v41 = vmul.f32 %v1840_v15, %v1127_v54  ;;  %v1842_v38 = vpop.eup %1841  ;;  %vm1134_vm9 = vweird.f32 %v1840_v15 }
 0x3a5   :  { %v1097_v56 = vsel %vm1096_vm5, %v1836_v40, %v1093_v55  ;;  %v1137_v40 = vand.u32 2147483647, %v1127_v54  ;;  %vm1135_vm11 = vmor %vm1133_vm10, %vm1134_vm9  ;;  %v3436_v55 = vld [vmem:[#allocation62_spill] sm:$0xff] }
 0x3a6   :  { %v1102_v37 = vsel %vm1099_vm7, %v1101_v52, %v1097_v56  ;;  %v1116_v39 = vsel %vm1115_vm6, %v1838_v53, %v1112_v34  ;;  %v1130_v33 = vsub.f32 1.0, %v1129_v41 }
 0x3a7   :  { %v1121_v51 = vsel %vm1118_vm8, %v1120_v43, %v1116_v39  ;;  %v1144_v45 = vmul.f32 %v1842_v38, %v1102_v37  ;;  %vm1138_vm12 = vcmp.eq.f32.partialorder %v1137_v40, 8.507059e+37 }
 0x3a8   :  { %v1143_v26 = vmul.f32 %v1121_v51, %v2965_v49  ;;  %v1131_v30 = vmul.f32 %v1840_v15, %v1130_v33 }
 0x3aa   :  { %v3037_v46 = vadd.f32 %v1144_v45, %v1143_v26  ;;  %v1132_v58 = vadd.f32 %v1840_v15, %v1131_v30 }
 0x3ac   :  { %1843 = vtanh.f32 %v3037_v46  ;;  %v1136_v42 = vsel %vm1135_vm11, %v1840_v15, %v1132_v58 }
 0x3ad   :  { %v1141_v41 = vsel %vm1138_vm12, %v1140_v36, %v1136_v42 }
 0x3b2   :  { %v1844_v47 = vpop.eup %1843 }
 0x3b3   :  { %v1147_v53 = vmul.f32 %v1844_v47, %v1141_v41 }
 0x3b5   :  { %1168 = vmatmul.f32.vlgmr.msra.gmra.mxu0 %v1147_v53  ;;  %1188 = vmatmul.f32.vlgmr.msrb.gmra.mxu1 %v1147_v53 }
 0x3b6   :  { %1208 = vmatmul.f32.vlgmr.msrb.gmra.mxu2 %v1147_v53  ;;  %1228 = vmatmul.f32.vlgmr.msrb.gmra.mxu3 %v1147_v53 }
 0x3b7   :  { %1454 = vmatpush.msra.mxu0 %v2696_v1  ;;  %1474 = vmatpush.msrb.mxu1 %v2699_v59  ;;  %v3407_v1 = vld [vmem:[#allocation36_spill] sm:$0xff]  ;;  %v3408_v59 = vld [vmem:[#allocation26_spill] sm:$0xff] }
 0x3b8   :  { %1494 = vmatpush.msrb.mxu2 %v2702_v60  ;;  %1514 = vmatpush.msrb.mxu3 %v2705_v62  ;;  %v3409_v60 = vld [vmem:[#allocation21_spill] sm:$0xff] }
 0x3b9   :  { %1455 = vmatpush.msra.mxu0 %v2708_v3  ;;  %1475 = vmatpush.msrb.mxu1 %v2711_v10  ;;  %v3410_v62 = vld [vmem:[#allocation17_spill] sm:$0xff]  ;;  %v3411_v3 = vld [vmem:[#allocation32_spill] sm:$0xff] }
 0x3ba   :  { %1495 = vmatpush.msrb.mxu2 %v2714_v5  ;;  %1515 = vmatpush.msrb.mxu3 %v2717_v22  ;;  %v3412_v10 = vld [vmem:[#allocation20_spill] sm:$0xff]  ;;  %v3413_v5 = vld [vmem:[#allocation30_spill] sm:$0xff] }
 0x3bb   :  { %1456 = vmatpush.msra.mxu0 %v2720_v48  ;;  %1476 = vmatpush.msrb.mxu1 %v2723_v13  ;;  %v3414_v22 = vld [vmem:[#allocation24_spill] sm:$0xff]  ;;  %v3415_v48 = vld [vmem:[#allocation22_spill] sm:$0xff] }
 0x3bc   :  { %1496 = vmatpush.msrb.mxu2 %v2726_v8  ;;  %1516 = vmatpush.msrb.mxu3 %v2729_v7  ;;  %v3416_v13 = vld [vmem:[#allocation18_spill] sm:$0xff]  ;;  %v3417_v8 = vld [vmem:[#allocation23_spill] sm:$0xff]  ;;  %v3418_v7 = vld [vmem:[#allocation33_spill] sm:$0xff] }
 0x3bd   :  { %1457 = vmatpush.msra.mxu0 %v2732_v12  ;;  %1477 = vmatpush.msrb.mxu1 %v2735_v20  ;;  %v3419_v12 = vld [vmem:[#allocation31_spill] sm:$0xff] }
 0x3be   :  { %1497 = vmatpush.msrb.mxu2 %v2738_v35  ;;  %1517 = vmatpush.msrb.mxu3 %v2741_v14  ;;  %v3420_v20 = vld [vmem:[#allocation39_spill] sm:$0xff]  ;;  %v3421_v35 = vld [vmem:[#allocation28_spill] sm:$0xff] }
 0x3bf   :  { %1458 = vmatpush.msra.mxu0 %v2744_v18  ;;  %1478 = vmatpush.msrb.mxu1 %v2747_v57  ;;  %v3422_v14 = vld [vmem:[#allocation35_spill] sm:$0xff]  ;;  %v3423_v18 = vld [vmem:[#allocation25_spill] sm:$0xff]  ;;  %v3424_v57 = vld [vmem:[#allocation34_spill] sm:$0xff] }
 0x3c0   :  { %1498 = vmatpush.msrb.mxu2 %v2750_v0  ;;  %1518 = vmatpush.msrb.mxu3 %v2753_v9  ;;  %v3425_v0 = vld [vmem:[#allocation19_spill] sm:$0xff]  ;;  %v3426_v9 = vld [vmem:[#allocation40_spill] sm:$0xff] }
 0x3c1   :  { %1459 = vmatpush.msra.mxu0 %v2756_v63  ;;  %1479 = vmatpush.msrb.mxu1 %v2759_v21  ;;  %v3427_v63 = vld [vmem:[#allocation38_spill] sm:$0xff]  ;;  %v3428_v21 = vld [vmem:[#allocation29_spill] sm:$0xff] }
 0x3c2   :  { %1499 = vmatpush.msrb.mxu2 %v2762_v17  ;;  %1519 = vmatpush.msrb.mxu3 %v2765_v23  ;;  %v3429_v17 = vld [vmem:[#allocation27_spill] sm:$0xff]  ;;  %v3430_v23 = vld [vmem:[#allocation37_spill] sm:$0xff] }
 0x3c3   :  { %1460 = vmatpush.msra.mxu0 %v2768_v11  ;;  %1480 = vmatpush.msrb.mxu1 %v2771_v61  ;;  %v3431_v11 = vld [vmem:[#allocation42_spill] sm:$0xff]  ;;  %v3432_v61 = vld [vmem:[#allocation41_spill] sm:$0xff] }
 0x3c4   :  { %1500 = vmatpush.msrb.mxu2 %v2774_v6  ;;  %1520 = vmatpush.msrb.mxu3 %v2777_v4 }
 0x3c5   :  { %1461 = vmatpush.msra.mxu0 %v2780_v2  ;;  %1481 = vmatpush.msrb.mxu1 %v2783_v16  ;;  %v3433_v2 = vld [vmem:[#allocation16_spill] sm:$0xff] }
 0x3c6   :  { %1501 = vmatpush.msrb.mxu2 %v2786_v19  ;;  %1521 = vmatpush.msrb.mxu3 %v2789_v24  ;;  %v3434_v19 = vld [vmem:[#allocation61_spill] sm:$0xff] }
 0x3c7   :  { %1462 = vmatpush.msra.mxu0 %v2792_v25  ;;  %1482 = vmatpush.msrb.mxu1 %v2795_v27 }
 0x3c8   :  { %1502 = vmatpush.msrb.mxu2 %v2798_v28  ;;  %1522 = vmatpush.msrb.mxu3 %v2801_v29  ;;  %v3435_v29 = vld [vmem:[#allocation63_spill] sm:$0xff] }
 0x3c9   :  { %1463 = vmatpush.msra.mxu0 %v2804_v31  ;;  %1483 = vmatpush.msrb.mxu1 %v2807_v32 }
 0x3ca   :  { %1503 = vmatpush.msrb.mxu2 %v3407_v1  ;;  %1523 = vmatpush.msrb.mxu3 %v3408_v59 }
 0x3cb   :  { %1464 = vmatpush.msra.mxu0 %v3409_v60  ;;  %1484 = vmatpush.msrb.mxu1 %v3410_v62 }
 0x3cc   :  { %1504 = vmatpush.msrb.mxu2 %v3411_v3  ;;  %1524 = vmatpush.msrb.mxu3 %v3412_v10 }
 0x3cd   :  { %1465 = vmatpush.msra.mxu0 %v3413_v5  ;;  %1485 = vmatpush.msrb.mxu1 %v3414_v22 }
 0x3ce   :  { %1505 = vmatpush.msrb.mxu2 %v3415_v48  ;;  %1525 = vmatpush.msrb.mxu3 %v3416_v13 }
 0x3cf   :  { %1466 = vmatpush.msra.mxu0 %v3417_v8  ;;  %1486 = vmatpush.msrb.mxu1 %v3418_v7 }
 0x3d0   :  { %1506 = vmatpush.msrb.mxu2 %v3419_v12  ;;  %1526 = vmatpush.msrb.mxu3 %v3420_v20 }
 0x3d1   :  { %1467 = vmatpush.msra.mxu0 %v3421_v35  ;;  %1487 = vmatpush.msrb.mxu1 %v3422_v14 }
 0x3d2   :  { %1507 = vmatpush.msrb.mxu2 %v3423_v18  ;;  %1527 = vmatpush.msrb.mxu3 %v3424_v57 }
 0x3d3   :  { %1468 = vmatpush.msra.mxu0 %v3425_v0  ;;  %1488 = vmatpush.msrb.mxu1 %v3426_v9 }
 0x3d4   :  { %1508 = vmatpush.msrb.mxu2 %v3427_v63  ;;  %1528 = vmatpush.msrb.mxu3 %v3428_v21  ;;  %v3437_v21 = vld [vmem:[#allocation43_spill] sm:$0xff] }
 0x3d5   :  { %1469 = vmatpush.msra.mxu0 %v3429_v17  ;;  %1489 = vmatpush.msrb.mxu1 %v3430_v23  ;;  %v3438_v23 = vld [vmem:[#allocation64_spill] sm:$0xff] }
 0x3d6   :  { %1509 = vmatpush.msrb.mxu2 %v3431_v11  ;;  %1529 = vmatpush.msrb.mxu3 %v3432_v61 }
 0x432   :  { %v1169_v6 = vpop.f32.mrf.mxu0  ;;  %v1189_v4 = vpop.f32.mrf.mxu1 }
 0x433   :  { %v1232_v16 = vadd.f32 %v1169_v6, %v3433_v2  ;;  %v1233_v24 = vadd.f32 %v1189_v4, %v3434_v19  ;;  %v3439_v2 = vld [vmem:[#allocation66_spill] sm:$0xff] }
 0x435   :  { %v1733_v25 = vmul.f32 -1.442695, %v1232_v16  ;;  %v1734_v27 = vmul.f32 -1.442695, %v1233_v24 }
 0x437   :  { %1845 = vpow2.f32 %v1733_v25 }
 0x438   :  { %1847 = vpow2.f32 %v1734_v27 }
 0x439   :  { %v1229_v28 = vpop.f32.mrf.mxu3  ;;  %v1209_v37 = vpop.f32.mrf.mxu2 }
 0x43a   :  { %v1235_v31 = vadd.f32 %v1229_v28, %v3435_v29  ;;  %v1234_v52 = vadd.f32 %v1209_v37, %v3436_v55 }
 0x43c   :  { %v1735_v32 = vmul.f32 -1.442695, %v1235_v31 }
 0x43d   :  { %v1846_v49 = vpop.eup %1845 }
 0x43e   :  { %v1848_v26 = vpop.eup %1847  ;;  %v1239_v45 = vadd.f32 1.0, %v1846_v49  ;;  %1849 = vpow2.f32 %v1735_v32 }
 0x43f   :  { %v1258_v33 = vadd.f32 1.0, %v1848_v26  ;;  %v3440_v26 = vld [vmem:[#allocation65_spill] sm:$0xff] }
 0x440   :  { %1851 = vrcp.f32 %v1239_v45  ;;  %v1251_v51 = vand.u32 2147483648, %v1239_v45  ;;  %v1249_v44 = vand.u32 2147483647, %v1239_v45  ;;  %vm1245_vm15 = vweird.f32 %v1239_v45 }
 0x441   :  { %1853 = vrcp.f32 %v1258_v33  ;;  %v1270_v30 = vand.u32 2147483648, %v1258_v33  ;;  %v1268_v42 = vand.u32 2147483647, %v1258_v33  ;;  %vm1264_vm0 = vweird.f32 %v1258_v33 }
 0x442   :  { %v1252_v41 = vor.u32 1.1754944e-38, %v1251_v51  ;;  %vm1250_vm3 = vcmp.eq.f32.partialorder %v1249_v44, 8.507059e+37 }
 0x443   :  { %v1271_v59 = vor.u32 1.1754944e-38, %v1270_v30  ;;  %vm1269_vm4 = vcmp.eq.f32.partialorder %v1268_v42, 8.507059e+37 }
 0x444   :  { %v1850_v15 = vpop.eup %1849 }
 0x445   :  { %v1278_v54 = vadd.f32 1.0, %v1850_v15 }
 0x446   :  { %v1852_v50 = vpop.eup %1851 }
 0x447   :  { %v1854_v34 = vpop.eup %1853  ;;  %v1241_v43 = vmul.f32 %v1852_v50, %v1239_v45  ;;  %1855 = vrcp.f32 %v1278_v54  ;;  %vm1246_vm13 = vweird.f32 %v1852_v50  ;;  %v1290_v20 = vand.u32 2147483648, %v1278_v54 }
 0x448   :  { %v1260_v56 = vmul.f32 %v1854_v34, %v1258_v33  ;;  %1857 = vtanh.f32 %v1234_v52  ;;  %vm1265_vm14 = vweird.f32 %v1854_v34  ;;  %vm1247_vm1 = vmor %vm1245_vm15, %vm1246_vm13  ;;  %vm1284_vm6 = vweird.f32 %v1278_v54 }
 0x449   :  { %v1242_v38 = vsub.f32 1.0, %v1241_v43  ;;  %vm1266_vm2 = vmor %vm1264_vm0, %vm1265_vm14  ;;  %v1288_v35 = vand.u32 2147483647, %v1278_v54  ;;  %v1291_v18 = vor.u32 1.1754944e-38, %v1290_v20 }
 0x44a   :  { %v1261_v39 = vsub.f32 1.0, %v1260_v56 }
 0x44b   :  { %v1243_v58 = vmul.f32 %v1852_v50, %v1242_v38  ;;  %vm1289_vm8 = vcmp.eq.f32.partialorder %v1288_v35, 8.507059e+37  ;;  %v1615_v35 = vld [vmem:[#allocation8 + $0x70] sm:$0xff] }
 0x44c   :  { %v1262_v40 = vmul.f32 %v1854_v34, %v1261_v39 }
 0x44d   :  { %v1856_v36 = vpop.eup %1855  ;;  %v1244_v47 = vadd.f32 %v1852_v50, %v1243_v58 }
 0x44e   :  { %v1263_v53 = vadd.f32 %v1854_v34, %v1262_v40  ;;  %v1280_v1 = vmul.f32 %v1856_v36, %v1278_v54  ;;  %v1858_v62 = vpop.eup %1857  ;;  %vm1285_vm5 = vweird.f32 %v1856_v36 }
 0x44f   :  { %v1248_v60 = vsel %vm1247_vm1, %v1852_v50, %v1244_v47  ;;  %vm1286_vm7 = vmor %vm1284_vm6, %vm1285_vm5 }
 0x450   :  { %v1253_v3 = vsel %vm1250_vm3, %v1252_v41, %v1248_v60  ;;  %v1267_v10 = vsel %vm1266_vm2, %v1854_v34, %v1263_v53  ;;  %v1281_v5 = vsub.f32 1.0, %v1280_v1 }
 0x451   :  { %v1272_v22 = vsel %vm1269_vm4, %v1271_v59, %v1267_v10  ;;  %v1295_v48 = vmul.f32 %v1858_v62, %v1253_v3 }
 0x452   :  { %v1294_v13 = vmul.f32 %v1272_v22, %v3037_v46  ;;  %v1282_v8 = vmul.f32 %v1856_v36, %v1281_v5 }
 0x454   :  { %v3109_v7 = vadd.f32 %v1295_v48, %v1294_v13  ;;  %v1283_v12 = vadd.f32 %v1856_v36, %v1282_v8 }
 0x456   :  { %1859 = vtanh.f32 %v3109_v7  ;;  %v1287_v14 = vsel %vm1286_vm7, %v1856_v36, %v1283_v12 }
 0x457   :  { %v1292_v0 = vsel %vm1289_vm8, %v1291_v18, %v1287_v14  ;;  %v1614_v14 = vld [vmem:[#allocation8 + $0x68] sm:$0xff]  ;;  %v1613_v18 = vld [vmem:[#allocation8 + $0x60] sm:$0xff] }
 0x45c   :  { %v1860_v57 = vpop.eup %1859 }
 0x45d   :  { %v1298_v9 = vmul.f32 %v1860_v57, %v1292_v0  ;;  %v1612_v57 = vld [vmem:[#allocation8 + $0x58] sm:$0xff]  ;;  %v1611_v0 = vld [vmem:[#allocation8 + $0x50] sm:$0xff] }
 0x45f   :  { %1319 = vmatmul.f32.vlgmr.msrb.gmra.mxu0 %v1298_v9  ;;  %1339 = vmatmul.f32.vlgmr.msra.gmra.mxu1 %v1298_v9 }
 0x460   :  { %1359 = vmatmul.f32.vlgmr.msra.gmra.mxu2 %v1298_v9  ;;  %1379 = vmatmul.f32.vlgmr.msra.gmra.mxu3 %v1298_v9  ;;  %v1610_v9 = vld [vmem:[#allocation8 + $0x48] sm:$0xff] }
 0x4dc   :  { %v1320_v46 = vpop.f32.mrf.mxu0  ;;  %v1340_v63 = vpop.f32.mrf.mxu1 }
 0x4dd   :  { %v1383_v17 = vadd.f32 %v1320_v46, %v3437_v21  ;;  %v1384_v11 = vadd.f32 %v1340_v63, %v3438_v23  ;;  %v1609_v46 = vld [vmem:[#allocation8 + $0x40] sm:$0xff]  ;;  %v1608_v63 = vld [vmem:[#allocation8 + $0x38] sm:$0xff]  ;;  %v1607_v21 = vld [vmem:[#allocation8 + $0x30] sm:$0xff] }
 0x4df   :  { %v1736_v61 = vmul.f32 -1.442695, %v1383_v17  ;;  %v1737_v6 = vmul.f32 -1.442695, %v1384_v11  ;;  %v3441_v11 = vld [vmem:[#allocation44_spill] sm:$0xff] }
 0x4e1   :  { %1861 = vpow2.f32 %v1736_v61 }
 0x4e2   :  { %1863 = vpow2.f32 %v1737_v6  ;;  %v3442_v6 = vld [vmem:[#allocation67_spill] sm:$0xff] }
 0x4e3   :  { %v1380_v4 = vpop.f32.mrf.mxu3  ;;  %v1360_v29 = vpop.f32.mrf.mxu2 }
 0x4e4   :  { %v1386_v16 = vadd.f32 %v1380_v4, %v3439_v2  ;;  %v1385_v45 = vadd.f32 %v1360_v29, %v3440_v26  ;;  %v1606_v2 = vld [vmem:[#allocation8 + $0x28] sm:$0xff] }
 0x4e5   :  { %v1602_v29 = vld [vmem:[#allocation8 + $0x8] sm:$0xff] }
 0x4e6   :  { %v1738_v19 = vmul.f32 -1.442695, %v1386_v16 }
 0x4e7   :  { %v1862_v24 = vpop.eup %1861 }
 0x4e8   :  { %v1864_v25 = vpop.eup %1863  ;;  %v1390_v27 = vadd.f32 1.0, %v1862_v24  ;;  %1865 = vpow2.f32 %v1738_v19  ;;  %v1605_v24 = vld [vmem:[#allocation8 + $0x20] sm:$0xff] }
 0x4e9   :  { %v1409_v28 = vadd.f32 1.0, %v1864_v25  ;;  %v1604_v25 = vld [vmem:[#allocation8 + $0x18] sm:$0xff] }
 0x4ea   :  { %1867 = vrcp.f32 %v1390_v27  ;;  %v1402_v55 = vand.u32 2147483648, %v1390_v27  ;;  %v1400_v43 = vand.u32 2147483647, %v1390_v27  ;;  %vm1396_vm11 = vweird.f32 %v1390_v27 }
 0x4eb   :  { %1869 = vrcp.f32 %v1409_v28  ;;  %v1421_v52 = vand.u32 2147483648, %v1409_v28  ;;  %v1419_v38 = vand.u32 2147483647, %v1409_v28  ;;  %vm1415_vm12 = vweird.f32 %v1409_v28 }
 0x4ec   :  { %v1403_v30 = vor.u32 1.1754944e-38, %v1402_v55  ;;  %vm1401_vm15 = vcmp.eq.f32.partialorder %v1400_v43, 8.507059e+37 }
 0x4ed   :  { %v1422_v40 = vor.u32 1.1754944e-38, %v1421_v52  ;;  %vm1420_vm0 = vcmp.eq.f32.partialorder %v1419_v38, 8.507059e+37 }
 0x4ee   :  { %v1866_v31 = vpop.eup %1865 }
 0x4ef   :  { %v1429_v32 = vadd.f32 1.0, %v1866_v31  ;;  %v3443_v31 = vld [vmem:[#allocation69_spill] sm:$0xff] }
 0x4f0   :  { %v1868_v49 = vpop.eup %1867 }
 0x4f1   :  { %v1870_v33 = vpop.eup %1869  ;;  %v1392_v37 = vmul.f32 %v1868_v49, %v1390_v27  ;;  %1871 = vrcp.f32 %v1429_v32  ;;  %vm1397_vm9 = vweird.f32 %v1868_v49  ;;  %v1441_v5 = vand.u32 2147483648, %v1429_v32  ;;  %v1603_v27 = vld [vmem:[#allocation8 + $0x10] sm:$0xff] }
 0x4f2   :  { %v1411_v15 = vmul.f32 %v1870_v33, %v1409_v28  ;;  %1873 = vtanh.f32 %v1385_v45  ;;  %vm1416_vm10 = vweird.f32 %v1870_v33  ;;  %vm1398_vm13 = vmor %vm1396_vm11, %vm1397_vm9  ;;  %vm1435_vm2 = vweird.f32 %v1429_v32 }
 0x4f3   :  { %v1393_v54 = vsub.f32 1.0, %v1392_v37  ;;  %vm1417_vm14 = vmor %vm1415_vm12, %vm1416_vm10  ;;  %v1439_v22 = vand.u32 2147483647, %v1429_v32  ;;  %v1442_v13 = vor.u32 1.1754944e-38, %v1441_v5 }
 0x4f4   :  { %v1412_v50 = vsub.f32 1.0, %v1411_v15 }
 0x4f5   :  { %v1394_v34 = vmul.f32 %v1868_v49, %v1393_v54  ;;  %vm1440_vm4 = vcmp.eq.f32.partialorder %v1439_v22, 8.507059e+37 }
 0x4f6   :  { %v1413_v56 = vmul.f32 %v1870_v33, %v1412_v50 }
 0x4f7   :  { %v1872_v39 = vpop.eup %1871  ;;  %v1395_v51 = vadd.f32 %v1868_v49, %v1394_v34  ;;  %v3444_v34 = vld [vmem:[#allocation68_spill] sm:$0xff] }
 0x4f8   :  { %v1414_v58 = vadd.f32 %v1870_v33, %v1413_v56  ;;  %v1431_v44 = vmul.f32 %v1872_v39, %v1429_v32  ;;  %v1874_v36 = vpop.eup %1873  ;;  %vm1436_vm1 = vweird.f32 %v1872_v39 }
 0x4f9   :  { %v1399_v42 = vsel %vm1398_vm13, %v1868_v49, %v1395_v51  ;;  %vm1437_vm3 = vmor %vm1435_vm2, %vm1436_vm1  ;;  %v1601_v49 = vld [vmem:[#allocation8] sm:$0xff] }
 0x4fa   :  { %v1404_v47 = vsel %vm1401_vm15, %v1403_v30, %v1399_v42  ;;  %v1418_v41 = vsel %vm1417_vm14, %v1870_v33, %v1414_v58  ;;  %v1432_v53 = vsub.f32 1.0, %v1431_v44 }
 0x4fb   :  { %v1423_v1 = vsel %vm1420_vm0, %v1422_v40, %v1418_v41  ;;  %v1446_v59 = vmul.f32 %v1874_v36, %v1404_v47 }
 0x4fc   :  { %v1445_v60 = vmul.f32 %v1423_v1, %v3109_v7  ;;  %v1433_v62 = vmul.f32 %v1872_v39, %v1432_v53  ;;  %v1616_v7 = vld [vmem:[#allocation8 + $0x78] sm:$0xff] }
 0x4fd   :  { %1621 = vmatpush.msrb.mxu0 %v1616_v7 }
 0x4fe   :  { %v3117_v3 = vadd.f32 %v1446_v59, %v1445_v60  ;;  %v1434_v10 = vadd.f32 %v1872_v39, %v1433_v62 }
 0x4ff   :  { %1622 = vmatpush.msrb.mxu0 %v1615_v35 }
 0x500   :  { %1875 = vtanh.f32 %v3117_v3  ;;  %v1438_v48 = vsel %vm1437_vm3, %v1872_v39, %v1434_v10 }
 0x501   :  { %v1443_v12 = vsel %vm1440_vm4, %v1442_v13, %v1438_v48  ;;  %1623 = vmatpush.msrb.mxu0 %v1614_v14 }
 0x503   :  { %1624 = vmatpush.msrb.mxu0 %v1613_v18 }
 0x505   :  { %1625 = vmatpush.msrb.mxu0 %v1612_v57 }
 0x506   :  { %v1876_v8 = vpop.eup %1875 }
 0x507   :  { %v1449_v20 = vmul.f32 %v1876_v8, %v1443_v12  ;;  %1626 = vmatpush.msrb.mxu0 %v1611_v0 }
 0x509   :  { %1470 = vmatmul.f32.vlgmr.msra.gmra.mxu0 %v1449_v20  ;;  %1490 = vmatmul.f32.vlgmr.msrb.gmra.mxu1 %v1449_v20 }
 0x50a   :  { %1510 = vmatmul.f32.vlgmr.msrb.gmra.mxu2 %v1449_v20  ;;  %1530 = vmatmul.f32.vlgmr.msrb.gmra.mxu3 %v1449_v20 }
 0x50b   :  { %1627 = vmatpush.msrb.mxu0 %v1610_v9 }
 0x50d   :  { %1628 = vmatpush.msrb.mxu0 %v1609_v46 }
 0x50f   :  { %1629 = vmatpush.msrb.mxu0 %v1608_v63 }
 0x511   :  { %1630 = vmatpush.msrb.mxu0 %v1607_v21 }
 0x513   :  { %1631 = vmatpush.msrb.mxu0 %v1606_v2 }
 0x515   :  { %1632 = vmatpush.msrb.mxu0 %v1605_v24 }
 0x517   :  { %1633 = vmatpush.msrb.mxu0 %v1604_v25 }
 0x519   :  { %1634 = vmatpush.msrb.mxu0 %v1603_v27 }
 0x51b   :  { %1635 = vmatpush.msrb.mxu0 %v1602_v29 }
 0x51d   :  { %1636 = vmatpush.msrb.mxu0 %v1601_v49 }
 0x586   :  { %v1471_v17 = vpop.f32.mrf.mxu0  ;;  %v1491_v23 = vpop.f32.mrf.mxu1 }
 0x587   :  { %v1534_v61 = vadd.f32 %v1471_v17, %v3441_v11  ;;  %v1535_v4 = vadd.f32 %v1491_v23, %v3442_v6 }
 0x589   :  { %v1739_v16 = vmul.f32 -1.442695, %v1534_v61  ;;  %v1740_v19 = vmul.f32 -1.442695, %v1535_v4 }
 0x58b   :  { %1877 = vpow2.f32 %v1739_v16 }
 0x58c   :  { %1879 = vpow2.f32 %v1740_v19 }
 0x58d   :  { %v1531_v28 = vpop.f32.mrf.mxu3  ;;  %v1511_v54 = vpop.f32.mrf.mxu2 }
 0x58e   :  { %v1537_v32 = vadd.f32 %v1531_v28, %v3443_v31  ;;  %v1536_v43 = vadd.f32 %v1511_v54, %v3444_v34 }
 0x590   :  { %v1741_v26 = vmul.f32 -1.442695, %v1537_v32 }
 0x591   :  { %v1878_v45 = vpop.eup %1877 }
 0x592   :  { %v1880_v33 = vpop.eup %1879  ;;  %v1541_v37 = vadd.f32 1.0, %v1878_v45  ;;  %1881 = vpow2.f32 %v1741_v26 }
 0x593   :  { %v1560_v15 = vadd.f32 1.0, %v1880_v33 }
 0x594   :  { %1883 = vrcp.f32 %v1541_v37  ;;  %v1553_v58 = vand.u32 2147483648, %v1541_v37  ;;  %v1551_v42 = vand.u32 2147483647, %v1541_v37  ;;  %vm1547_vm7 = vweird.f32 %v1541_v37 }
 0x595   :  { %1885 = vrcp.f32 %v1560_v15  ;;  %v1572_v44 = vand.u32 2147483648, %v1560_v15  ;;  %v1570_v47 = vand.u32 2147483647, %v1560_v15  ;;  %vm1566_vm8 = vweird.f32 %v1560_v15 }
 0x596   :  { %v1554_v1 = vor.u32 1.1754944e-38, %v1553_v58  ;;  %vm1552_vm11 = vcmp.eq.f32.partialorder %v1551_v42, 8.507059e+37 }
 0x597   :  { %v1573_v62 = vor.u32 1.1754944e-38, %v1572_v44  ;;  %vm1571_vm12 = vcmp.eq.f32.partialorder %v1570_v47, 8.507059e+37 }
 0x598   :  { %v1882_v50 = vpop.eup %1881 }
 0x599   :  { %v1580_v55 = vadd.f32 1.0, %v1882_v50 }
 0x59a   :  { %v1884_v52 = vpop.eup %1883 }
 0x59b   :  { %v1886_v56 = vpop.eup %1885  ;;  %v1543_v38 = vmul.f32 %v1884_v52, %v1541_v37  ;;  %1887 = vrcp.f32 %v1580_v55  ;;  %vm1548_vm5 = vweird.f32 %v1884_v52  ;;  %v1592_v18 = vand.u32 2147483648, %v1580_v55 }
 0x59c   :  { %v1562_v39 = vmul.f32 %v1886_v56, %v1560_v15  ;;  %1889 = vtanh.f32 %v1536_v43  ;;  %vm1567_vm6 = vweird.f32 %v1886_v56  ;;  %vm1549_vm9 = vmor %vm1547_vm7, %vm1548_vm5  ;;  %vm1586_vm14 = vweird.f32 %v1580_v55 }
 0x59d   :  { %v1544_v51 = vsub.f32 1.0, %v1543_v38  ;;  %vm1568_vm10 = vmor %vm1566_vm8, %vm1567_vm6  ;;  %v1590_v57 = vand.u32 2147483647, %v1580_v55  ;;  %v1593_v9 = vor.u32 1.1754944e-38, %v1592_v18 }
 0x59e   :  { %v1563_v30 = vsub.f32 1.0, %v1562_v39 }
 0x59f   :  { %v1545_v40 = vmul.f32 %v1884_v52, %v1544_v51  ;;  %vm1591_vm0 = vcmp.eq.f32.partialorder %v1590_v57, 8.507059e+37 }
 0x5a0   :  { %v1564_v36 = vmul.f32 %v1886_v56, %v1563_v30 }
 0x5a1   :  { %v1888_v41 = vpop.eup %1887  ;;  %v1546_v53 = vadd.f32 %v1884_v52, %v1545_v40 }
 0x5a2   :  { %v1565_v59 = vadd.f32 %v1886_v56, %v1564_v36  ;;  %v1582_v60 = vmul.f32 %v1888_v41, %v1580_v55  ;;  %v1890_v5 = vpop.eup %1889  ;;  %vm1587_vm13 = vweird.f32 %v1888_v41 }
 0x5a3   :  { %v1550_v10 = vsel %vm1549_vm9, %v1884_v52, %v1546_v53  ;;  %vm1588_vm15 = vmor %vm1586_vm14, %vm1587_vm13 }
 0x5a4   :  { %v1555_v22 = vsel %vm1552_vm11, %v1554_v1, %v1550_v10  ;;  %v1569_v48 = vsel %vm1568_vm10, %v1886_v56, %v1565_v59  ;;  %v1583_v13 = vsub.f32 1.0, %v1582_v60 }
 0x5a5   :  { %v1574_v8 = vsel %vm1571_vm12, %v1573_v62, %v1569_v48  ;;  %v1597_v12 = vmul.f32 %v1890_v5, %v1555_v22 }
 0x5a6   :  { %v1596_v20 = vmul.f32 %v1574_v8, %v3117_v3  ;;  %v1584_v7 = vmul.f32 %v1888_v41, %v1583_v13  ;;  %v1764_v3 = vld [vmem:[%s3139_s5] ss:$0 sm:$0xff]  ;;  %s2098_s5 = smov [#allocation9]  }
 0x5a7   :  { %s1657_s16 = sshll.u32 %s2098_s5, 4  ;;  %s1658_s16 = int_to_ptr.vmem [resolvable:$true] %s1657_s16 }
 0x5a8   :  { %v1598_v35 = vadd.f32 %v1597_v12, %v1596_v20  ;;  %v1585_v14 = vadd.f32 %v1888_v41, %v1584_v7 }
 0x5aa   :  { %1891 = vtanh.f32 %v1598_v35  ;;  %v1589_v0 = vsel %vm1588_vm15, %v1888_v41, %v1585_v14 }
 0x5ab   :  { %v1594_v63 = vsel %vm1591_vm0, %v1593_v9, %v1589_v0 }
 0x5b0   :  { %v1892_v46 = vpop.eup %1891 }
 0x5b1   :  { %v1600_v21 = vmul.f32 %v1892_v46, %v1594_v63 }
 0x5b3   :  { %1637 = vmatmul.f32.vlgmr.msrb.gmra.mxu0 %v1600_v21 }
 0x630   :  { %v1638_v17 = vpop.f32.mrf.mxu0 }
 0x631   :  { %v1639_v23 = vadd.f32 %v1764_v3, %v1638_v17 }
 0x633   :  { %1641 = vst [vmem:[#allocation10] sm:$0xff] %v1639_v23  ;;  %1642 = vmax.xlane.f32.xlu0 %v1639_v23 }
 0x634   :  { %1673 = dma.vmem_to_hbm [thread:$0]  %s1669_s13, 128, %s1671_s2, [#allocation11]  }
 0x6a6   :  { %v1643_v11 = vpop.xlane.xlu0 %1642 }
 0x6a7   :  { %v1644_v61 = vsub.f32 %v1639_v23, %v1643_v11 }
 0x6a9   :  { %v1645_v6 = vmul.f32 1.442695, %v1644_v61 }
 0x6ab   :  { %1893 = vpow2.f32 %v1645_v6 }
 0x6b1   :  { %v1894_v4 = vpop.eup %1893 }
 0x6b2   :  { %1647 = vadd.xlane.f32.xlu0 %v1894_v4 }
 0x725   :  { %v1648_v2 = vpop.xlane.xlu0 %1647 }
 0x726   :  { %1895 = vrcp.f32 %v1648_v2 }
 0x72c   :  { %v1896_v16 = vpop.eup %1895 }
 0x72d   :  { %v1650_v19 = vmul.f32 %v1896_v16, %v1894_v4 }
 0x72f   :  { %1651 = vst [vmem:[#allocation9] sm:$0xff] %v1650_v19 }
 0x730   :  { %1662 = dma.vmem_to_hbm [thread:$0]  %s1658_s16, 128, %s1660_s1, [#allocation5]  }
 0x731   :  { %2085 = dma.done.wait [#allocation5], 128  }
 0x732   :  { %2086 = vsyncadd [#allocation5], 4294967168 }
 0x733   :  { %2087 = dma.done.wait [#allocation11], 128  }
 0x734   :  { %2088 = vsyncadd [#allocation11], 4294967168 }
 0x735   :  { %1682 = vsyncpa [#allocation4], 1 }
 0x736   :  { %1683 = vsyncpa [#allocation7], 1 }
 0x737   :  { %1684 = vsyncpa [#allocation5], 1 }
 0x738   :  { %1685 = vsyncpa [#allocation11], 1 }

</bundles_post_ra>
